<compile_context>
chip_gen: v7x
topology: tpu7x:2x2x1
jax: 0.10.0
libtpu: 0.0.40
codegen_flags: <defaults>
</compile_context>

<pallas_src>
import jax
import jax.numpy as jnp
import numpy as np
from jax import lax
from jax.experimental import pallas as pl
from jax.experimental.pallas import tpu as pltpu


def _conv3x3_bn_relu(pad_ref, src, w_ref, scale, shift, Nb, Hh, Wh, C, Cout):
    """3x3 SAME conv + folded eval-BN + ReLU via tap-looped MXU accumulation.

    pad_ref : (Nb, Hh+2, Wh+2, C) bf16 VMEM scratch (1-px zero halo)
    src     : (Nb, Hh, Wh, C)     bf16 activation value
    w_ref   : (9*C, Cout)         bf16 weights, tap-major rows (dy, dx, c)
    scale/shift : (1, C*) f32 folded BN parameters (conv bias folded in)
    returns : (Nb*Hh*Wh, Cout) f32, post-ReLU
    """
    # Zero only the 1-px halo; the interior is fully overwritten each step.
    # Done every step: scratch is per-core persistent and under "parallel"
    # semantics program_id==0 may never run on a given core's scratch.
    zrow = jnp.zeros((Nb, 1, Wh + 2, C), jnp.bfloat16)
    zcol = jnp.zeros((Nb, Hh + 2, 1, C), jnp.bfloat16)
    pad_ref[:, 0:1, :, :] = zrow
    pad_ref[:, Hh + 1:Hh + 2, :, :] = zrow
    pad_ref[:, :, 0:1, :] = zcol
    pad_ref[:, :, Wh + 1:Wh + 2, :] = zcol
    pad_ref[:, 1:Hh + 1, 1:Wh + 1, :] = src

    M = Nb * Hh * Wh
    acc = jnp.zeros((M, Cout), jnp.float32)
    # 9 small matmuls instead of materializing a (M, 9*C) im2col lhs; every
    # tap is a static window of the padded scratch -> one bf16 load each.
    for dy in range(3):
        for dx in range(3):
            t = dy * 3 + dx
            tap = pad_ref[:, dy:dy + Hh, dx:dx + Wh, :].reshape(M, C)
            acc = acc + jnp.dot(tap, w_ref[t * C:(t + 1) * C, :],
                                preferred_element_type=jnp.float32)
    return jnp.maximum(acc * scale + shift, 0.0)       # BN(eval) + ReLU, f32


def _down_kernel(x_ref, w1_ref, w2_ref, s1_ref, t1_ref, s2_ref, t2_ref,
                 o_ref, p1_ref, p2_ref):
    """One batch-block per grid step.

    x_ref  : (Nb, 4, Hh, Wh, Cin) bf16 -- axis 1 holds the 2x2 pool window
             (split in the wrapper, so the pool needs no strided reads).
    w1_ref : (9*Cin,  Cmid) bf16   conv1 weights, tap-major (dy, dx, cin)
    w2_ref : (9*Cmid, Cout) bf16   conv2 weights
    s*/t*  : (1, C) f32            folded BN scale / shift
    o_ref  : (Nb, Hh, Wh, Cout)
    p1/p2  : bf16 VMEM scratch, zero-halo padded activations
    """
    Nb, _, Hh, Wh, Cin = x_ref.shape
    Cmid = s1_ref.shape[1]
    Cout = s2_ref.shape[1]

    # ---- MaxPool2d(2): 3 lane-wide VPU max ops over 4 major-dim slabs -------
    pooled = jnp.maximum(
        jnp.maximum(x_ref[:, 0, :, :, :], x_ref[:, 1, :, :, :]),
        jnp.maximum(x_ref[:, 2, :, :, :], x_ref[:, 3, :, :, :]))

    # ---- conv1 -> BN -> ReLU -------------------------------------------------
    y1 = _conv3x3_bn_relu(p1_ref, pooled, w1_ref, s1_ref[...], t1_ref[...],
                          Nb, Hh, Wh, Cin, Cmid)

    # ---- conv2 -> BN -> ReLU -------------------------------------------------
    y2 = _conv3x3_bn_relu(p2_ref,
                          y1.reshape(Nb, Hh, Wh, Cmid).astype(jnp.bfloat16),
                          w2_ref, s2_ref[...], t2_ref[...],
                          Nb, Hh, Wh, Cmid, Cout)

    o_ref[...] = y2.reshape(Nb, Hh, Wh, Cout).astype(o_ref.dtype)


def _pick_batch_block(n, hh, wh, target_m=256):
    """Largest divisor of n with M = nb*hh*wh near target, keeping grid >= 2."""
    want = max(1, -(-target_m // (hh * wh)))       # ceil(target / per-image M)
    if n >= 2:
        want = min(want, n // 2)                   # >=2 grid steps -> both v7x TCs
    best = 1
    for d in range(1, n + 1):
        if n % d == 0 and d <= want:
            best = d
    return best


def _padded_vmem_bytes(shape, itemsize):
    """VMEM footprint of one buffer, accounting for (sublane, 128) tile padding."""
    sub = {1: 32, 2: 16, 4: 8}.get(itemsize, 8)
    s = list(shape)
    s[-1] = -(-s[-1] // 128) * 128
    if len(s) >= 2:
        s[-2] = -(-s[-2] // sub) * sub
    total = itemsize
    for d in s:
        total *= d
    return total


def down_forward(x_nchw, w1_hwio, w2_hwio, scale1, shift1, scale2, shift2,
                 *, out_dtype=jnp.float32):
    """Down.forward.  x_nchw: (N, Cin, H, W) -> (N, Cout, H//2, W//2)."""
    N, Cin, H, W = x_nchw.shape
    # PyTorch MaxPool2d(2) floors odd sizes; this kernel requires even H, W.
    assert H % 2 == 0 and W % 2 == 0, "Down kernel requires even spatial dims"
    Hh, Wh = H // 2, W // 2
    Cmid = w1_hwio.shape[3]
    Cout = w2_hwio.shape[3]

    nb = _pick_batch_block(N, Hh, Wh)
    grid = (N // nb,)

    # Layout glue: a single fused XLA copy (the NCHW->NHWC permute we need
    # anyway) that also splits each 2x2 pool window onto a small leading axis
    # and casts to bf16 (halves HBM read vs an f32 input).
    x = (x_nchw.reshape(N, Cin, Hh, 2, Wh, 2)
               .transpose(0, 3, 5, 2, 4, 1)          # (N, 2, 2, Hh, Wh, Cin)
               .reshape(N, 4, Hh, Wh, Cin)
               .astype(jnp.bfloat16))
    w1 = w1_hwio.reshape(9 * Cin, Cmid).astype(jnp.bfloat16)
    w2 = w2_hwio.reshape(9 * Cmid, Cout).astype(jnp.bfloat16)
    s1 = scale1.reshape(1, Cmid).astype(jnp.float32)
    t1 = shift1.reshape(1, Cmid).astype(jnp.float32)
    s2 = scale2.reshape(1, Cout).astype(jnp.float32)
    t2 = shift2.reshape(1, Cout).astype(jnp.float32)

    out_isize = jnp.dtype(out_dtype).itemsize

    # VMEM budget: double-buffered input/output blocks + weights + scratches
    # + live in-kernel temporaries, with ~25% headroom (32 MiB floor).
    vmem_est = (
        2 * _padded_vmem_bytes((nb, 4, Hh, Wh, Cin), 2)
        + 2 * _padded_vmem_bytes((nb, Hh, Wh, Cout), out_isize)
        + 2 * _padded_vmem_bytes((9 * Cin, Cmid), 2)
        + 2 * _padded_vmem_bytes((9 * Cmid, Cout), 2)
        + 8 * _padded_vmem_bytes((1, max(Cmid, Cout)), 4)
        + _padded_vmem_bytes((nb, Hh + 2, Wh + 2, Cin), 2)
        + _padded_vmem_bytes((nb, Hh + 2, Wh + 2, Cmid), 2)
        + 2 * _padded_vmem_bytes((nb, Hh, Wh, max(Cin, Cmid)), 2)
        + 3 * _padded_vmem_bytes((nb * Hh * Wh, max(Cmid, Cout)), 4)
    )
    vmem_limit = int(min(max(32 * 2**20, 1.25 * vmem_est), 96 * 2**20))

    flops = 2 * N * Hh * Wh * 9 * (Cin * Cmid + Cmid * Cout)
    bytes_accessed = (N * 4 * Hh * Wh * Cin * 2
                      + N * Hh * Wh * Cout * out_isize
                      + (9 * Cin * Cmid + 9 * Cmid * Cout) * 2
                      + 2 * 4 * (Cmid + Cout))

    out = pl.pallas_call(
        _down_kernel,
        out_shape=jax.ShapeDtypeStruct((N, Hh, Wh, Cout), out_dtype),
        grid_spec=pltpu.PrefetchScalarGridSpec(
            num_scalar_prefetch=0,
            grid=grid,
            in_specs=[
                pl.BlockSpec((nb, 4, Hh, Wh, Cin), lambda g: (g, 0, 0, 0, 0)),
                pl.BlockSpec((9 * Cin, Cmid), lambda g: (0, 0)),
                pl.BlockSpec((9 * Cmid, Cout), lambda g: (0, 0)),
                pl.BlockSpec((1, Cmid), lambda g: (0, 0)),
                pl.BlockSpec((1, Cmid), lambda g: (0, 0)),
                pl.BlockSpec((1, Cout), lambda g: (0, 0)),
                pl.BlockSpec((1, Cout), lambda g: (0, 0)),
            ],
            out_specs=pl.BlockSpec((nb, Hh, Wh, Cout), lambda g: (g, 0, 0, 0)),
            scratch_shapes=[
                pltpu.VMEM((nb, Hh + 2, Wh + 2, Cin), jnp.bfloat16),
                pltpu.VMEM((nb, Hh + 2, Wh + 2, Cmid), jnp.bfloat16),
            ],
        ),
        # batch blocks are independent -> shard across v7x's 2 TensorCores.
        compiler_params=pltpu.CompilerParams(
            dimension_semantics=("parallel",),
            vmem_limit_bytes=vmem_limit),
        cost_estimate=pl.CostEstimate(flops=flops, transcendentals=0,
                                      bytes_accessed=bytes_accessed),
    )(x, w1, w2, s1, t1, s2, t2)

    # glue: NHWC -> NCHW
    return jnp.transpose(out, (0, 3, 1, 2))


def _reference(x_nchw, w1, w2, scale1, shift1, scale2, shift2,
               *, quantize_bf16=False):
    """Pure-JAX reference.  With quantize_bf16=True it rounds the matmul
    operands at the same points the kernel does (tight structural check)."""
    N, Cin, H, W = x_nchw.shape
    x = jnp.transpose(x_nchw, (0, 2, 3, 1)).astype(jnp.float32)
    pooled = x.reshape(N, H // 2, 2, W // 2, 2, Cin).max(axis=(2, 4))

    def q(a):
        return a.astype(jnp.bfloat16).astype(jnp.float32) if quantize_bf16 else a

    dn = ("NHWC", "HWIO", "NHWC")
    c1 = lax.conv_general_dilated(q(pooled), q(w1), (1, 1), "SAME",
                                  dimension_numbers=dn,
                                  precision=lax.Precision.HIGHEST)
    y1 = jnp.maximum(c1 * scale1 + shift1, 0.0)
    c2 = lax.conv_general_dilated(q(y1), q(w2), (1, 1), "SAME",
                                  dimension_numbers=dn,
                                  precision=lax.Precision.HIGHEST)
    y2 = jnp.maximum(c2 * scale2 + shift2, 0.0)
    return jnp.transpose(y2, (0, 3, 1, 2))


def _fold_bn(conv_bias, gamma, beta, running_mean, running_var, eps=1e-5):
    scale = gamma / jnp.sqrt(running_var + eps)
    shift = beta + (conv_bias - running_mean) * scale
    return scale, shift


if __name__ == "__main__":
    # Down(in_channels=4, out_channels=8) on a (2, 4, 16, 16) input.
    N, Cin, H, W = 2, 4, 16, 16
    Cmid = Cout = 8

    key = jax.random.PRNGKey(0)
    keys = jax.random.split(key, 12)

    x = jax.random.normal(keys[0], (N, Cin, H, W), jnp.float32)

    # conv weights in HWIO layout (equivalent to PyTorch OIHW up to transpose)
    w1 = 0.2 * jax.random.normal(keys[1], (3, 3, Cin, Cmid), jnp.float32)
    b1 = 0.1 * jax.random.normal(keys[2], (Cmid,), jnp.float32)
    g1 = 1.0 + 0.1 * jax.random.normal(keys[3], (Cmid,), jnp.float32)
    be1 = 0.1 * jax.random.normal(keys[4], (Cmid,), jnp.float32)
    m1 = 0.1 * jax.random.normal(keys[5], (Cmid,), jnp.float32)
    v1 = jax.random.uniform(keys[6], (Cmid,), jnp.float32, 0.5, 1.5)

    w2 = 0.2 * jax.random.normal(keys[7], (3, 3, Cmid, Cout), jnp.float32)
    b2 = 0.1 * jax.random.normal(keys[8], (Cout,), jnp.float32)
    g2 = 1.0 + 0.1 * jax.random.normal(keys[9], (Cout,), jnp.float32)
    be2 = 0.1 * jax.random.normal(keys[10], (Cout,), jnp.float32)
    m2 = 0.1 * jax.random.normal(keys[11], (Cout,), jnp.float32)
    v2 = jax.random.uniform(keys[0], (Cout,), jnp.float32, 0.5, 1.5)

    scale1, shift1 = _fold_bn(b1, g1, be1, m1, v1)
    scale2, shift2 = _fold_bn(b2, g2, be2, m2, v2)

    args = (x, w1, w2, scale1, shift1, scale2, shift2)

    down_f32 = jax.jit(lambda *a: down_forward(*a, out_dtype=jnp.float32))
    out = jax.block_until_ready(down_f32(*args))
    assert out.shape == (N, Cout, H // 2, W // 2)

    # Tight check: reference with the same bf16 operand quantization points.
    ref_q = _reference(*args, quantize_bf16=True)
    np.testing.assert_allclose(np.asarray(out), np.asarray(ref_q),
                               rtol=1e-3, atol=1e-3)

    # Loose sanity check against the full-f32 reference (bf16 operand error).
    ref_f = _reference(*args, quantize_bf16=False)
    np.testing.assert_allclose(np.asarray(out), np.asarray(ref_f),
                               rtol=5e-2, atol=5e-2)

    # bf16-output variant (halves output writeback; perf-review item #10).
    down_bf16 = jax.jit(lambda *a: down_forward(*a, out_dtype=jnp.bfloat16))
    out_b = jax.block_until_ready(down_bf16(*args))
    assert out_b.dtype == jnp.bfloat16 and out_b.shape == out.shape
    np.testing.assert_allclose(np.asarray(out_b, dtype=np.float32),
                               np.asarray(out), rtol=2e-2, atol=2e-2)

    print("KERNEL_OK")
</pallas_src>

<mosaic_0001>
module attributes {stable_mosaic.version = 11 : i64} {
  func.func @_down_kernel(%arg0: i32, %arg1: memref<1x4x8x8x4xbf16, #tpu.memory_space<vmem>>, %arg2: memref<36x8xbf16, #tpu.memory_space<vmem>>, %arg3: memref<72x8xbf16, #tpu.memory_space<vmem>>, %arg4: memref<1x8xf32, #tpu.memory_space<vmem>>, %arg5: memref<1x8xf32, #tpu.memory_space<vmem>>, %arg6: memref<1x8xf32, #tpu.memory_space<vmem>>, %arg7: memref<1x8xf32, #tpu.memory_space<vmem>>, %arg8: memref<1x8x8x8xf32, #tpu.memory_space<vmem>>, %arg9: memref<1x10x10x4xbf16, #tpu.memory_space<vmem>>, %arg10: memref<1x10x10x8xbf16, #tpu.memory_space<vmem>>) attributes {dimension_semantics = [#tpu.dimension_semantics<parallel>], iteration_bounds = array<i64: 2>, scalar_prefetch = 0 : i64, scratch_operands = 2 : i64, tpu.core_type = #tpu.core_type<tc>, window_params = [{transform_indices = @transform_0, window_bounds = array<i64: 1, 4, 8, 8, 4>}, {pipeline_mode = #tpu.pipeline_mode<synchronous>, transform_indices = @transform_1, window_bounds = array<i64: 36, 8>}, {pipeline_mode = #tpu.pipeline_mode<synchronous>, transform_indices = @transform_2, window_bounds = array<i64: 72, 8>}, {pipeline_mode = #tpu.pipeline_mode<synchronous>, transform_indices = @transform_3, window_bounds = array<i64: 1, 8>}, {pipeline_mode = #tpu.pipeline_mode<synchronous>, transform_indices = @transform_4, window_bounds = array<i64: 1, 8>}, {pipeline_mode = #tpu.pipeline_mode<synchronous>, transform_indices = @transform_5, window_bounds = array<i64: 1, 8>}, {pipeline_mode = #tpu.pipeline_mode<synchronous>, transform_indices = @transform_6, window_bounds = array<i64: 1, 8>}, {transform_indices = @transform_7, window_bounds = array<i64: 1, 8, 8, 8>}]} {
    %c0 = arith.constant 0 : index
    %c0_0 = arith.constant 0 : index
    %c0_1 = arith.constant 0 : index
    %c0_2 = arith.constant 0 : index
    %c0_3 = arith.constant 0 : index
    %0 = vector.load %arg1[%c0, %c0_0, %c0_1, %c0_2, %c0_3] : memref<1x4x8x8x4xbf16, #tpu.memory_space<vmem>>, vector<1x1x8x8x4xbf16>
    %1 = vector.shape_cast %0 : vector<1x1x8x8x4xbf16> to vector<1x8x8x4xbf16>
    %c0_4 = arith.constant 0 : index
    %c1 = arith.constant 1 : index
    %c0_5 = arith.constant 0 : index
    %c0_6 = arith.constant 0 : index
    %c0_7 = arith.constant 0 : index
    %2 = vector.load %arg1[%c0_4, %c1, %c0_5, %c0_6, %c0_7] : memref<1x4x8x8x4xbf16, #tpu.memory_space<vmem>>, vector<1x1x8x8x4xbf16>
    %3 = vector.shape_cast %2 : vector<1x1x8x8x4xbf16> to vector<1x8x8x4xbf16>
    %4 = arith.maximumf %1, %3 : vector<1x8x8x4xbf16>
    %c0_8 = arith.constant 0 : index
    %c2 = arith.constant 2 : index
    %c0_9 = arith.constant 0 : index
    %c0_10 = arith.constant 0 : index
    %c0_11 = arith.constant 0 : index
    %5 = vector.load %arg1[%c0_8, %c2, %c0_9, %c0_10, %c0_11] : memref<1x4x8x8x4xbf16, #tpu.memory_space<vmem>>, vector<1x1x8x8x4xbf16>
    %6 = vector.shape_cast %5 : vector<1x1x8x8x4xbf16> to vector<1x8x8x4xbf16>
    %c0_12 = arith.constant 0 : index
    %c3 = arith.constant 3 : index
    %c0_13 = arith.constant 0 : index
    %c0_14 = arith.constant 0 : index
    %c0_15 = arith.constant 0 : index
    %7 = vector.load %arg1[%c0_12, %c3, %c0_13, %c0_14, %c0_15] : memref<1x4x8x8x4xbf16, #tpu.memory_space<vmem>>, vector<1x1x8x8x4xbf16>
    %8 = vector.shape_cast %7 : vector<1x1x8x8x4xbf16> to vector<1x8x8x4xbf16>
    %9 = arith.maximumf %6, %8 : vector<1x8x8x4xbf16>
    %10 = arith.maximumf %4, %9 : vector<1x8x8x4xbf16>
    %c0_16 = arith.constant 0 : index
    %c0_17 = arith.constant 0 : index
    %11 = vector.load %arg4[%c0_16, %c0_17] : memref<1x8xf32, #tpu.memory_space<vmem>>, vector<1x8xf32>
    %c0_18 = arith.constant 0 : index
    %c0_19 = arith.constant 0 : index
    %12 = vector.load %arg5[%c0_18, %c0_19] : memref<1x8xf32, #tpu.memory_space<vmem>>, vector<1x8xf32>
    %cst = arith.constant 0.000000e+00 : bf16
    %13 = vector.broadcast %cst : bf16 to vector<1x1x10x4xbf16>
    %cst_20 = arith.constant 0.000000e+00 : bf16
    %14 = vector.broadcast %cst_20 : bf16 to vector<1x10x1x4xbf16>
    %c0_21 = arith.constant 0 : index
    %c0_22 = arith.constant 0 : index
    %c0_23 = arith.constant 0 : index
    %c0_24 = arith.constant 0 : index
    %15 = vector.load %arg9[%c0_21, %c0_22, %c0_23, %c0_24] : memref<1x10x10x4xbf16, #tpu.memory_space<vmem>>, vector<1x1x10x4xbf16>
    tpu.vector_store %arg9[%c0_21, %c0_22, %c0_23, %c0_24], %13 {strides = array<i32>} : memref<1x10x10x4xbf16, #tpu.memory_space<vmem>>, vector<1x1x10x4xbf16>,
    %c0_25 = arith.constant 0 : index
    %c9 = arith.constant 9 : index
    %c0_26 = arith.constant 0 : index
    %c0_27 = arith.constant 0 : index
    %16 = vector.load %arg9[%c0_25, %c9, %c0_26, %c0_27] : memref<1x10x10x4xbf16, #tpu.memory_space<vmem>>, vector<1x1x10x4xbf16>
    tpu.vector_store %arg9[%c0_25, %c9, %c0_26, %c0_27], %13 {strides = array<i32>} : memref<1x10x10x4xbf16, #tpu.memory_space<vmem>>, vector<1x1x10x4xbf16>,
    %c0_28 = arith.constant 0 : index
    %c0_29 = arith.constant 0 : index
    %c0_30 = arith.constant 0 : index
    %c0_31 = arith.constant 0 : index
    %17 = vector.load %arg9[%c0_28, %c0_29, %c0_30, %c0_31] : memref<1x10x10x4xbf16, #tpu.memory_space<vmem>>, vector<1x10x1x4xbf16>
    tpu.vector_store %arg9[%c0_28, %c0_29, %c0_30, %c0_31], %14 {strides = array<i32>} : memref<1x10x10x4xbf16, #tpu.memory_space<vmem>>, vector<1x10x1x4xbf16>,
    %c0_32 = arith.constant 0 : index
    %c0_33 = arith.constant 0 : index
    %c9_34 = arith.constant 9 : index
    %c0_35 = arith.constant 0 : index
    %18 = vector.load %arg9[%c0_32, %c0_33, %c9_34, %c0_35] : memref<1x10x10x4xbf16, #tpu.memory_space<vmem>>, vector<1x10x1x4xbf16>
    tpu.vector_store %arg9[%c0_32, %c0_33, %c9_34, %c0_35], %14 {strides = array<i32>} : memref<1x10x10x4xbf16, #tpu.memory_space<vmem>>, vector<1x10x1x4xbf16>,
    %c0_36 = arith.constant 0 : index
    %c1_37 = arith.constant 1 : index
    %c1_38 = arith.constant 1 : index
    %c0_39 = arith.constant 0 : index
    %19 = vector.load %arg9[%c0_36, %c1_37, %c1_38, %c0_39] : memref<1x10x10x4xbf16, #tpu.memory_space<vmem>>, vector<1x8x8x4xbf16>
    tpu.vector_store %arg9[%c0_36, %c1_37, %c1_38, %c0_39], %10 {strides = array<i32>} : memref<1x10x10x4xbf16, #tpu.memory_space<vmem>>, vector<1x8x8x4xbf16>,
    %cst_40 = arith.constant 0.000000e+00 : f32
    %20 = vector.broadcast %cst_40 : f32 to vector<64x8xf32>
    %c0_41 = arith.constant 0 : index
    %c0_42 = arith.constant 0 : index
    %c0_43 = arith.constant 0 : index
    %c0_44 = arith.constant 0 : index
    %21 = vector.load %arg9[%c0_41, %c0_42, %c0_43, %c0_44] : memref<1x10x10x4xbf16, #tpu.memory_space<vmem>>, vector<1x8x8x4xbf16>
    %22 = vector.shape_cast %21 : vector<1x8x8x4xbf16> to vector<64x4xbf16>
    %c0_45 = arith.constant 0 : index
    %c0_46 = arith.constant 0 : index
    %23 = vector.load %arg2[%c0_45, %c0_46] : memref<36x8xbf16, #tpu.memory_space<vmem>>, vector<4x8xbf16>
    %cst_47 = arith.constant dense<0.000000e+00> : vector<64x8xf32>
    %24 = tpu.matmul %22, %23, %cst_47 {dimension_numbers = #tpu.dot_dimension_numbers<[1], [0], [0], [1], [0, 0, 1, 1], [], []>} : vector<64x4xbf16>, vector<4x8xbf16>, vector<64x8xf32> -> vector<64x8xf32>
    %25 = arith.addf %20, %24 : vector<64x8xf32>
    %c0_48 = arith.constant 0 : index
    %c0_49 = arith.constant 0 : index
    %c1_50 = arith.constant 1 : index
    %c0_51 = arith.constant 0 : index
    %26 = vector.load %arg9[%c0_48, %c0_49, %c1_50, %c0_51] : memref<1x10x10x4xbf16, #tpu.memory_space<vmem>>, vector<1x8x8x4xbf16>
    %27 = vector.shape_cast %26 : vector<1x8x8x4xbf16> to vector<64x4xbf16>
    %c4 = arith.constant 4 : index
    %c0_52 = arith.constant 0 : index
    %28 = vector.load %arg2[%c4, %c0_52] : memref<36x8xbf16, #tpu.memory_space<vmem>>, vector<4x8xbf16>
    %cst_53 = arith.constant dense<0.000000e+00> : vector<64x8xf32>
    %29 = tpu.matmul %27, %28, %cst_53 {dimension_numbers = #tpu.dot_dimension_numbers<[1], [0], [0], [1], [0, 0, 1, 1], [], []>} : vector<64x4xbf16>, vector<4x8xbf16>, vector<64x8xf32> -> vector<64x8xf32>
    %30 = arith.addf %25, %29 : vector<64x8xf32>
    %c0_54 = arith.constant 0 : index
    %c0_55 = arith.constant 0 : index
    %c2_56 = arith.constant 2 : index
    %c0_57 = arith.constant 0 : index
    %31 = vector.load %arg9[%c0_54, %c0_55, %c2_56, %c0_57] : memref<1x10x10x4xbf16, #tpu.memory_space<vmem>>, vector<1x8x8x4xbf16>
    %32 = vector.shape_cast %31 : vector<1x8x8x4xbf16> to vector<64x4xbf16>
    %c8 = arith.constant 8 : index
    %c0_58 = arith.constant 0 : index
    %33 = vector.load %arg2[%c8, %c0_58] : memref<36x8xbf16, #tpu.memory_space<vmem>>, vector<4x8xbf16>
    %cst_59 = arith.constant dense<0.000000e+00> : vector<64x8xf32>
    %34 = tpu.matmul %32, %33, %cst_59 {dimension_numbers = #tpu.dot_dimension_numbers<[1], [0], [0], [1], [0, 0, 1, 1], [], []>} : vector<64x4xbf16>, vector<4x8xbf16>, vector<64x8xf32> -> vector<64x8xf32>
    %35 = arith.addf %30, %34 : vector<64x8xf32>
    %c0_60 = arith.constant 0 : index
    %c1_61 = arith.constant 1 : index
    %c0_62 = arith.constant 0 : index
    %c0_63 = arith.constant 0 : index
    %36 = vector.load %arg9[%c0_60, %c1_61, %c0_62, %c0_63] : memref<1x10x10x4xbf16, #tpu.memory_space<vmem>>, vector<1x8x8x4xbf16>
    %37 = vector.shape_cast %36 : vector<1x8x8x4xbf16> to vector<64x4xbf16>
    %c12 = arith.constant 12 : index
    %c0_64 = arith.constant 0 : index
    %38 = vector.load %arg2[%c12, %c0_64] : memref<36x8xbf16, #tpu.memory_space<vmem>>, vector<4x8xbf16>
    %cst_65 = arith.constant dense<0.000000e+00> : vector<64x8xf32>
    %39 = tpu.matmul %37, %38, %cst_65 {dimension_numbers = #tpu.dot_dimension_numbers<[1], [0], [0], [1], [0, 0, 1, 1], [], []>} : vector<64x4xbf16>, vector<4x8xbf16>, vector<64x8xf32> -> vector<64x8xf32>
    %40 = arith.addf %35, %39 : vector<64x8xf32>
    %c0_66 = arith.constant 0 : index
    %c1_67 = arith.constant 1 : index
    %c1_68 = arith.constant 1 : index
    %c0_69 = arith.constant 0 : index
    %41 = vector.load %arg9[%c0_66, %c1_67, %c1_68, %c0_69] : memref<1x10x10x4xbf16, #tpu.memory_space<vmem>>, vector<1x8x8x4xbf16>
    %42 = vector.shape_cast %41 : vector<1x8x8x4xbf16> to vector<64x4xbf16>
    %c16 = arith.constant 16 : index
    %c0_70 = arith.constant 0 : index
    %43 = vector.load %arg2[%c16, %c0_70] : memref<36x8xbf16, #tpu.memory_space<vmem>>, vector<4x8xbf16>
    %cst_71 = arith.constant dense<0.000000e+00> : vector<64x8xf32>
    %44 = tpu.matmul %42, %43, %cst_71 {dimension_numbers = #tpu.dot_dimension_numbers<[1], [0], [0], [1], [0, 0, 1, 1], [], []>} : vector<64x4xbf16>, vector<4x8xbf16>, vector<64x8xf32> -> vector<64x8xf32>
    %45 = arith.addf %40, %44 : vector<64x8xf32>
    %c0_72 = arith.constant 0 : index
    %c1_73 = arith.constant 1 : index
    %c2_74 = arith.constant 2 : index
    %c0_75 = arith.constant 0 : index
    %46 = vector.load %arg9[%c0_72, %c1_73, %c2_74, %c0_75] : memref<1x10x10x4xbf16, #tpu.memory_space<vmem>>, vector<1x8x8x4xbf16>
    %47 = vector.shape_cast %46 : vector<1x8x8x4xbf16> to vector<64x4xbf16>
    %c20 = arith.constant 20 : index
    %c0_76 = arith.constant 0 : index
    %48 = vector.load %arg2[%c20, %c0_76] : memref<36x8xbf16, #tpu.memory_space<vmem>>, vector<4x8xbf16>
    %cst_77 = arith.constant dense<0.000000e+00> : vector<64x8xf32>
    %49 = tpu.matmul %47, %48, %cst_77 {dimension_numbers = #tpu.dot_dimension_numbers<[1], [0], [0], [1], [0, 0, 1, 1], [], []>} : vector<64x4xbf16>, vector<4x8xbf16>, vector<64x8xf32> -> vector<64x8xf32>
    %50 = arith.addf %45, %49 : vector<64x8xf32>
    %c0_78 = arith.constant 0 : index
    %c2_79 = arith.constant 2 : index
    %c0_80 = arith.constant 0 : index
    %c0_81 = arith.constant 0 : index
    %51 = vector.load %arg9[%c0_78, %c2_79, %c0_80, %c0_81] : memref<1x10x10x4xbf16, #tpu.memory_space<vmem>>, vector<1x8x8x4xbf16>
    %52 = vector.shape_cast %51 : vector<1x8x8x4xbf16> to vector<64x4xbf16>
    %c24 = arith.constant 24 : index
    %c0_82 = arith.constant 0 : index
    %53 = vector.load %arg2[%c24, %c0_82] : memref<36x8xbf16, #tpu.memory_space<vmem>>, vector<4x8xbf16>
    %cst_83 = arith.constant dense<0.000000e+00> : vector<64x8xf32>
    %54 = tpu.matmul %52, %53, %cst_83 {dimension_numbers = #tpu.dot_dimension_numbers<[1], [0], [0], [1], [0, 0, 1, 1], [], []>} : vector<64x4xbf16>, vector<4x8xbf16>, vector<64x8xf32> -> vector<64x8xf32>
    %55 = arith.addf %50, %54 : vector<64x8xf32>
    %c0_84 = arith.constant 0 : index
    %c2_85 = arith.constant 2 : index
    %c1_86 = arith.constant 1 : index
    %c0_87 = arith.constant 0 : index
    %56 = vector.load %arg9[%c0_84, %c2_85, %c1_86, %c0_87] : memref<1x10x10x4xbf16, #tpu.memory_space<vmem>>, vector<1x8x8x4xbf16>
    %57 = vector.shape_cast %56 : vector<1x8x8x4xbf16> to vector<64x4xbf16>
    %c28 = arith.constant 28 : index
    %c0_88 = arith.constant 0 : index
    %58 = vector.load %arg2[%c28, %c0_88] : memref<36x8xbf16, #tpu.memory_space<vmem>>, vector<4x8xbf16>
    %cst_89 = arith.constant dense<0.000000e+00> : vector<64x8xf32>
    %59 = tpu.matmul %57, %58, %cst_89 {dimension_numbers = #tpu.dot_dimension_numbers<[1], [0], [0], [1], [0, 0, 1, 1], [], []>} : vector<64x4xbf16>, vector<4x8xbf16>, vector<64x8xf32> -> vector<64x8xf32>
    %60 = arith.addf %55, %59 : vector<64x8xf32>
    %c0_90 = arith.constant 0 : index
    %c2_91 = arith.constant 2 : index
    %c2_92 = arith.constant 2 : index
    %c0_93 = arith.constant 0 : index
    %61 = vector.load %arg9[%c0_90, %c2_91, %c2_92, %c0_93] : memref<1x10x10x4xbf16, #tpu.memory_space<vmem>>, vector<1x8x8x4xbf16>
    %62 = vector.shape_cast %61 : vector<1x8x8x4xbf16> to vector<64x4xbf16>
    %c32 = arith.constant 32 : index
    %c0_94 = arith.constant 0 : index
    %63 = vector.load %arg2[%c32, %c0_94] : memref<36x8xbf16, #tpu.memory_space<vmem>>, vector<4x8xbf16>
    %cst_95 = arith.constant dense<0.000000e+00> : vector<64x8xf32>
    %64 = tpu.matmul %62, %63, %cst_95 {dimension_numbers = #tpu.dot_dimension_numbers<[1], [0], [0], [1], [0, 0, 1, 1], [], []>} : vector<64x4xbf16>, vector<4x8xbf16>, vector<64x8xf32> -> vector<64x8xf32>
    %65 = arith.addf %60, %64 : vector<64x8xf32>
    %66 = vector.broadcast %11 : vector<1x8xf32> to vector<64x8xf32>
    %67 = arith.mulf %65, %66 : vector<64x8xf32>
    %68 = vector.broadcast %12 : vector<1x8xf32> to vector<64x8xf32>
    %69 = arith.addf %67, %68 : vector<64x8xf32>
    %cst_96 = arith.constant 0.000000e+00 : f32
    %70 = vector.broadcast %cst_96 : f32 to vector<64x8xf32>
    %71 = arith.maximumf %69, %70 : vector<64x8xf32>
    %72 = vector.shape_cast %71 : vector<64x8xf32> to vector<1x8x8x8xf32>
    %73 = arith.truncf %72 : vector<1x8x8x8xf32> to vector<1x8x8x8xbf16>
    %c0_97 = arith.constant 0 : index
    %c0_98 = arith.constant 0 : index
    %74 = vector.load %arg6[%c0_97, %c0_98] : memref<1x8xf32, #tpu.memory_space<vmem>>, vector<1x8xf32>
    %c0_99 = arith.constant 0 : index
    %c0_100 = arith.constant 0 : index
    %75 = vector.load %arg7[%c0_99, %c0_100] : memref<1x8xf32, #tpu.memory_space<vmem>>, vector<1x8xf32>
    %cst_101 = arith.constant 0.000000e+00 : bf16
    %76 = vector.broadcast %cst_101 : bf16 to vector<1x1x10x8xbf16>
    %cst_102 = arith.constant 0.000000e+00 : bf16
    %77 = vector.broadcast %cst_102 : bf16 to vector<1x10x1x8xbf16>
    %c0_103 = arith.constant 0 : index
    %c0_104 = arith.constant 0 : index
    %c0_105 = arith.constant 0 : index
    %c0_106 = arith.constant 0 : index
    %78 = vector.load %arg10[%c0_103, %c0_104, %c0_105, %c0_106] : memref<1x10x10x8xbf16, #tpu.memory_space<vmem>>, vector<1x1x10x8xbf16>
    tpu.vector_store %arg10[%c0_103, %c0_104, %c0_105, %c0_106], %76 {strides = array<i32>} : memref<1x10x10x8xbf16, #tpu.memory_space<vmem>>, vector<1x1x10x8xbf16>,
    %c0_107 = arith.constant 0 : index
    %c9_108 = arith.constant 9 : index
    %c0_109 = arith.constant 0 : index
    %c0_110 = arith.constant 0 : index
    %79 = vector.load %arg10[%c0_107, %c9_108, %c0_109, %c0_110] : memref<1x10x10x8xbf16, #tpu.memory_space<vmem>>, vector<1x1x10x8xbf16>
    tpu.vector_store %arg10[%c0_107, %c9_108, %c0_109, %c0_110], %76 {strides = array<i32>} : memref<1x10x10x8xbf16, #tpu.memory_space<vmem>>, vector<1x1x10x8xbf16>,
    %c0_111 = arith.constant 0 : index
    %c0_112 = arith.constant 0 : index
    %c0_113 = arith.constant 0 : index
    %c0_114 = arith.constant 0 : index
    %80 = vector.load %arg10[%c0_111, %c0_112, %c0_113, %c0_114] : memref<1x10x10x8xbf16, #tpu.memory_space<vmem>>, vector<1x10x1x8xbf16>
    tpu.vector_store %arg10[%c0_111, %c0_112, %c0_113, %c0_114], %77 {strides = array<i32>} : memref<1x10x10x8xbf16, #tpu.memory_space<vmem>>, vector<1x10x1x8xbf16>,
    %c0_115 = arith.constant 0 : index
    %c0_116 = arith.constant 0 : index
    %c9_117 = arith.constant 9 : index
    %c0_118 = arith.constant 0 : index
    %81 = vector.load %arg10[%c0_115, %c0_116, %c9_117, %c0_118] : memref<1x10x10x8xbf16, #tpu.memory_space<vmem>>, vector<1x10x1x8xbf16>
    tpu.vector_store %arg10[%c0_115, %c0_116, %c9_117, %c0_118], %77 {strides = array<i32>} : memref<1x10x10x8xbf16, #tpu.memory_space<vmem>>, vector<1x10x1x8xbf16>,
    %c0_119 = arith.constant 0 : index
    %c1_120 = arith.constant 1 : index
    %c1_121 = arith.constant 1 : index
    %c0_122 = arith.constant 0 : index
    %82 = vector.load %arg10[%c0_119, %c1_120, %c1_121, %c0_122] : memref<1x10x10x8xbf16, #tpu.memory_space<vmem>>, vector<1x8x8x8xbf16>
    tpu.vector_store %arg10[%c0_119, %c1_120, %c1_121, %c0_122], %73 {strides = array<i32>} : memref<1x10x10x8xbf16, #tpu.memory_space<vmem>>, vector<1x8x8x8xbf16>,
    %cst_123 = arith.constant 0.000000e+00 : f32
    %83 = vector.broadcast %cst_123 : f32 to vector<64x8xf32>
    %c0_124 = arith.constant 0 : index
    %c0_125 = arith.constant 0 : index
    %c0_126 = arith.constant 0 : index
    %c0_127 = arith.constant 0 : index
    %84 = vector.load %arg10[%c0_124, %c0_125, %c0_126, %c0_127] : memref<1x10x10x8xbf16, #tpu.memory_space<vmem>>, vector<1x8x8x8xbf16>
    %85 = vector.shape_cast %84 : vector<1x8x8x8xbf16> to vector<64x8xbf16>
    %c0_128 = arith.constant 0 : index
    %c0_129 = arith.constant 0 : index
    %86 = vector.load %arg3[%c0_128, %c0_129] : memref<72x8xbf16, #tpu.memory_space<vmem>>, vector<8x8xbf16>
    %cst_130 = arith.constant dense<0.000000e+00> : vector<64x8xf32>
    %87 = tpu.matmul %85, %86, %cst_130 {dimension_numbers = #tpu.dot_dimension_numbers<[1], [0], [0], [1], [0, 0, 1, 1], [], []>} : vector<64x8xbf16>, vector<8x8xbf16>, vector<64x8xf32> -> vector<64x8xf32>
    %88 = arith.addf %83, %87 : vector<64x8xf32>
    %c0_131 = arith.constant 0 : index
    %c0_132 = arith.constant 0 : index
    %c1_133 = arith.constant 1 : index
    %c0_134 = arith.constant 0 : index
    %89 = vector.load %arg10[%c0_131, %c0_132, %c1_133, %c0_134] : memref<1x10x10x8xbf16, #tpu.memory_space<vmem>>, vector<1x8x8x8xbf16>
    %90 = vector.shape_cast %89 : vector<1x8x8x8xbf16> to vector<64x8xbf16>
    %c8_135 = arith.constant 8 : index
    %c0_136 = arith.constant 0 : index
    %91 = vector.load %arg3[%c8_135, %c0_136] : memref<72x8xbf16, #tpu.memory_space<vmem>>, vector<8x8xbf16>
    %cst_137 = arith.constant dense<0.000000e+00> : vector<64x8xf32>
    %92 = tpu.matmul %90, %91, %cst_137 {dimension_numbers = #tpu.dot_dimension_numbers<[1], [0], [0], [1], [0, 0, 1, 1], [], []>} : vector<64x8xbf16>, vector<8x8xbf16>, vector<64x8xf32> -> vector<64x8xf32>
    %93 = arith.addf %88, %92 : vector<64x8xf32>
    %c0_138 = arith.constant 0 : index
    %c0_139 = arith.constant 0 : index
    %c2_140 = arith.constant 2 : index
    %c0_141 = arith.constant 0 : index
    %94 = vector.load %arg10[%c0_138, %c0_139, %c2_140, %c0_141] : memref<1x10x10x8xbf16, #tpu.memory_space<vmem>>, vector<1x8x8x8xbf16>
    %95 = vector.shape_cast %94 : vector<1x8x8x8xbf16> to vector<64x8xbf16>
    %c16_142 = arith.constant 16 : index
    %c0_143 = arith.constant 0 : index
    %96 = vector.load %arg3[%c16_142, %c0_143] : memref<72x8xbf16, #tpu.memory_space<vmem>>, vector<8x8xbf16>
    %cst_144 = arith.constant dense<0.000000e+00> : vector<64x8xf32>
    %97 = tpu.matmul %95, %96, %cst_144 {dimension_numbers = #tpu.dot_dimension_numbers<[1], [0], [0], [1], [0, 0, 1, 1], [], []>} : vector<64x8xbf16>, vector<8x8xbf16>, vector<64x8xf32> -> vector<64x8xf32>
    %98 = arith.addf %93, %97 : vector<64x8xf32>
    %c0_145 = arith.constant 0 : index
    %c1_146 = arith.constant 1 : index
    %c0_147 = arith.constant 0 : index
    %c0_148 = arith.constant 0 : index
    %99 = vector.load %arg10[%c0_145, %c1_146, %c0_147, %c0_148] : memref<1x10x10x8xbf16, #tpu.memory_space<vmem>>, vector<1x8x8x8xbf16>
    %100 = vector.shape_cast %99 : vector<1x8x8x8xbf16> to vector<64x8xbf16>
    %c24_149 = arith.constant 24 : index
    %c0_150 = arith.constant 0 : index
    %101 = vector.load %arg3[%c24_149, %c0_150] : memref<72x8xbf16, #tpu.memory_space<vmem>>, vector<8x8xbf16>
    %cst_151 = arith.constant dense<0.000000e+00> : vector<64x8xf32>
    %102 = tpu.matmul %100, %101, %cst_151 {dimension_numbers = #tpu.dot_dimension_numbers<[1], [0], [0], [1], [0, 0, 1, 1], [], []>} : vector<64x8xbf16>, vector<8x8xbf16>, vector<64x8xf32> -> vector<64x8xf32>
    %103 = arith.addf %98, %102 : vector<64x8xf32>
    %c0_152 = arith.constant 0 : index
    %c1_153 = arith.constant 1 : index
    %c1_154 = arith.constant 1 : index
    %c0_155 = arith.constant 0 : index
    %104 = vector.load %arg10[%c0_152, %c1_153, %c1_154, %c0_155] : memref<1x10x10x8xbf16, #tpu.memory_space<vmem>>, vector<1x8x8x8xbf16>
    %105 = vector.shape_cast %104 : vector<1x8x8x8xbf16> to vector<64x8xbf16>
    %c32_156 = arith.constant 32 : index
    %c0_157 = arith.constant 0 : index
    %106 = vector.load %arg3[%c32_156, %c0_157] : memref<72x8xbf16, #tpu.memory_space<vmem>>, vector<8x8xbf16>
    %cst_158 = arith.constant dense<0.000000e+00> : vector<64x8xf32>
    %107 = tpu.matmul %105, %106, %cst_158 {dimension_numbers = #tpu.dot_dimension_numbers<[1], [0], [0], [1], [0, 0, 1, 1], [], []>} : vector<64x8xbf16>, vector<8x8xbf16>, vector<64x8xf32> -> vector<64x8xf32>
    %108 = arith.addf %103, %107 : vector<64x8xf32>
    %c0_159 = arith.constant 0 : index
    %c1_160 = arith.constant 1 : index
    %c2_161 = arith.constant 2 : index
    %c0_162 = arith.constant 0 : index
    %109 = vector.load %arg10[%c0_159, %c1_160, %c2_161, %c0_162] : memref<1x10x10x8xbf16, #tpu.memory_space<vmem>>, vector<1x8x8x8xbf16>
    %110 = vector.shape_cast %109 : vector<1x8x8x8xbf16> to vector<64x8xbf16>
    %c40 = arith.constant 40 : index
    %c0_163 = arith.constant 0 : index
    %111 = vector.load %arg3[%c40, %c0_163] : memref<72x8xbf16, #tpu.memory_space<vmem>>, vector<8x8xbf16>
    %cst_164 = arith.constant dense<0.000000e+00> : vector<64x8xf32>
    %112 = tpu.matmul %110, %111, %cst_164 {dimension_numbers = #tpu.dot_dimension_numbers<[1], [0], [0], [1], [0, 0, 1, 1], [], []>} : vector<64x8xbf16>, vector<8x8xbf16>, vector<64x8xf32> -> vector<64x8xf32>
    %113 = arith.addf %108, %112 : vector<64x8xf32>
    %c0_165 = arith.constant 0 : index
    %c2_166 = arith.constant 2 : index
    %c0_167 = arith.constant 0 : index
    %c0_168 = arith.constant 0 : index
    %114 = vector.load %arg10[%c0_165, %c2_166, %c0_167, %c0_168] : memref<1x10x10x8xbf16, #tpu.memory_space<vmem>>, vector<1x8x8x8xbf16>
    %115 = vector.shape_cast %114 : vector<1x8x8x8xbf16> to vector<64x8xbf16>
    %c48 = arith.constant 48 : index
    %c0_169 = arith.constant 0 : index
    %116 = vector.load %arg3[%c48, %c0_169] : memref<72x8xbf16, #tpu.memory_space<vmem>>, vector<8x8xbf16>
    %cst_170 = arith.constant dense<0.000000e+00> : vector<64x8xf32>
    %117 = tpu.matmul %115, %116, %cst_170 {dimension_numbers = #tpu.dot_dimension_numbers<[1], [0], [0], [1], [0, 0, 1, 1], [], []>} : vector<64x8xbf16>, vector<8x8xbf16>, vector<64x8xf32> -> vector<64x8xf32>
    %118 = arith.addf %113, %117 : vector<64x8xf32>
    %c0_171 = arith.constant 0 : index
    %c2_172 = arith.constant 2 : index
    %c1_173 = arith.constant 1 : index
    %c0_174 = arith.constant 0 : index
    %119 = vector.load %arg10[%c0_171, %c2_172, %c1_173, %c0_174] : memref<1x10x10x8xbf16, #tpu.memory_space<vmem>>, vector<1x8x8x8xbf16>
    %120 = vector.shape_cast %119 : vector<1x8x8x8xbf16> to vector<64x8xbf16>
    %c56 = arith.constant 56 : index
    %c0_175 = arith.constant 0 : index
    %121 = vector.load %arg3[%c56, %c0_175] : memref<72x8xbf16, #tpu.memory_space<vmem>>, vector<8x8xbf16>
    %cst_176 = arith.constant dense<0.000000e+00> : vector<64x8xf32>
    %122 = tpu.matmul %120, %121, %cst_176 {dimension_numbers = #tpu.dot_dimension_numbers<[1], [0], [0], [1], [0, 0, 1, 1], [], []>} : vector<64x8xbf16>, vector<8x8xbf16>, vector<64x8xf32> -> vector<64x8xf32>
    %123 = arith.addf %118, %122 : vector<64x8xf32>
    %c0_177 = arith.constant 0 : index
    %c2_178 = arith.constant 2 : index
    %c2_179 = arith.constant 2 : index
    %c0_180 = arith.constant 0 : index
    %124 = vector.load %arg10[%c0_177, %c2_178, %c2_179, %c0_180] : memref<1x10x10x8xbf16, #tpu.memory_space<vmem>>, vector<1x8x8x8xbf16>
    %125 = vector.shape_cast %124 : vector<1x8x8x8xbf16> to vector<64x8xbf16>
    %c64 = arith.constant 64 : index
    %c0_181 = arith.constant 0 : index
    %126 = vector.load %arg3[%c64, %c0_181] : memref<72x8xbf16, #tpu.memory_space<vmem>>, vector<8x8xbf16>
    %cst_182 = arith.constant dense<0.000000e+00> : vector<64x8xf32>
    %127 = tpu.matmul %125, %126, %cst_182 {dimension_numbers = #tpu.dot_dimension_numbers<[1], [0], [0], [1], [0, 0, 1, 1], [], []>} : vector<64x8xbf16>, vector<8x8xbf16>, vector<64x8xf32> -> vector<64x8xf32>
    %128 = arith.addf %123, %127 : vector<64x8xf32>
    %129 = vector.broadcast %74 : vector<1x8xf32> to vector<64x8xf32>
    %130 = arith.mulf %128, %129 : vector<64x8xf32>
    %131 = vector.broadcast %75 : vector<1x8xf32> to vector<64x8xf32>
    %132 = arith.addf %130, %131 : vector<64x8xf32>
    %cst_183 = arith.constant 0.000000e+00 : f32
    %133 = vector.broadcast %cst_183 : f32 to vector<64x8xf32>
    %134 = arith.maximumf %132, %133 : vector<64x8xf32>
    %135 = vector.shape_cast %134 : vector<64x8xf32> to vector<1x8x8x8xf32>
    %c0_184 = arith.constant 0 : index
    %c0_185 = arith.constant 0 : index
    %c0_186 = arith.constant 0 : index
    %c0_187 = arith.constant 0 : index
    %136 = vector.load %arg8[%c0_184, %c0_185, %c0_186, %c0_187] : memref<1x8x8x8xf32, #tpu.memory_space<vmem>>, vector<1x8x8x8xf32>
    tpu.vector_store %arg8[%c0_184, %c0_185, %c0_186, %c0_187], %135 {strides = array<i32>} : memref<1x8x8x8xf32, #tpu.memory_space<vmem>>, vector<1x8x8x8xf32>,
    return
  }
  func.func @transform_0(%arg0: i32) -> (i32, i32, i32, i32, i32) {
    %c0_i32 = arith.constant 0 : i32
    %c0_i32_0 = arith.constant 0 : i32
    %c0_i32_1 = arith.constant 0 : i32
    %c0_i32_2 = arith.constant 0 : i32
    %c0_i32_3 = arith.constant 0 : i32
    return %arg0, %c0_i32, %c0_i32_0, %c0_i32_1, %c0_i32_2 : i32, i32, i32, i32, i32
  }
  func.func @transform_1(%arg0: i32) -> (i32, i32) {
    %c0_i32 = arith.constant 0 : i32
    %c0_i32_0 = arith.constant 0 : i32
    %c0_i32_1 = arith.constant 0 : i32
    return %c0_i32, %c0_i32_0 : i32, i32
  }
  func.func @transform_2(%arg0: i32) -> (i32, i32) {
    %c0_i32 = arith.constant 0 : i32
    %c0_i32_0 = arith.constant 0 : i32
    %c0_i32_1 = arith.constant 0 : i32
    return %c0_i32, %c0_i32_0 : i32, i32
  }
  func.func @transform_3(%arg0: i32) -> (i32, i32) {
    %c0_i32 = arith.constant 0 : i32
    %c0_i32_0 = arith.constant 0 : i32
    %c0_i32_1 = arith.constant 0 : i32
    return %c0_i32, %c0_i32_0 : i32, i32
  }
  func.func @transform_4(%arg0: i32) -> (i32, i32) {
    %c0_i32 = arith.constant 0 : i32
    %c0_i32_0 = arith.constant 0 : i32
    %c0_i32_1 = arith.constant 0 : i32
    return %c0_i32, %c0_i32_0 : i32, i32
  }
  func.func @transform_5(%arg0: i32) -> (i32, i32) {
    %c0_i32 = arith.constant 0 : i32
    %c0_i32_0 = arith.constant 0 : i32
    %c0_i32_1 = arith.constant 0 : i32
    return %c0_i32, %c0_i32_0 : i32, i32
  }
  func.func @transform_6(%arg0: i32) -> (i32, i32) {
    %c0_i32 = arith.constant 0 : i32
    %c0_i32_0 = arith.constant 0 : i32
    %c0_i32_1 = arith.constant 0 : i32
    return %c0_i32, %c0_i32_0 : i32, i32
  }
  func.func @transform_7(%arg0: i32) -> (i32, i32, i32, i32) {
    %c0_i32 = arith.constant 0 : i32
    %c0_i32_0 = arith.constant 0 : i32
    %c0_i32_1 = arith.constant 0 : i32
    %c0_i32_2 = arith.constant 0 : i32
    return %arg0, %c0_i32, %c0_i32_0, %c0_i32_1 : i32, i32, i32, i32
  }
}

</mosaic_0001>

<bundles_post_ra>
// kernel: _lambda_.1
= control target key start
LH: loop header
LB: loop body
LE: loop exit
PB: predicated region body
PF: predicated region fallthrough
CT: control target
= control target key end

     0   :  { %s4666_s24 = smov 0   ;;  %s5650_s0 = inlined_call_operand.vmem [shape: bf16[2,4,8,8,4], index: 0, kind: input, shape index: {}]   ;;  %s5651_s1 = inlined_call_operand.vmem [shape: bf16[36,8], index: 1, kind: input, shape index: {}]   ;;  %s5652_s2 = inlined_call_operand.vmem [shape: bf16[72,8], index: 2, kind: input, shape index: {}]   ;;  %s5653_s3 = inlined_call_operand.vmem [shape: f32[1,8], index: 3, kind: input, shape index: {}]   ;;  %s5654_s4 = inlined_call_operand.vmem [shape: f32[1,8], index: 4, kind: input, shape index: {}]   ;;  %s5655_s5 = inlined_call_operand.vmem [shape: f32[1,8], index: 5, kind: input, shape index: {}]   ;;  %s5656_s6 = inlined_call_operand.vmem [shape: f32[1,8], index: 6, kind: input, shape index: {}]   ;;  %s5657_s7 = inlined_call_operand.vmem [shape: f32[2,8,8,8], index: 7, kind: output, shape index: {}]  }
   0x1 LB: > { %s3912_s25 = sadd.s32 4294967295, %s4623_s24   ;;  %p3916_p0 = scmp.ge.s32.totalorder %s4623_s24, 1  ;;  %s4623_s24 = sphi %s4666_s24, %s17_s24  }
   0x2   : > { %p237_p1 = scmp.lt.s32.totalorder %s4623_s24, 3 }
   0x4   : > { %p238_p2 = pnand %p3916_p0, %p237_p1 }
   0x5   : > { %v4590_v0 = vld [vmem:[%s5651_s1] ss:$0 sps:$4 sm:$0xcc] (!%p238_p2)   ;;  %vm706_vm0 = vcmask (!%p238_p2), 1041408   ;;  %p269_p3 = scmp.lt.s32.totalorder (!%p238_p2), %s3912_s25, 1  ;;  %vm341_vm1 = vcmask (!%p238_p2), 27648  }
   0x6   : > { %241 = sbr.rel (%p238_p2) target bundleno = 814 (0x32e), region = 48  ;;  %vm343_vm2 = vcmask (!%p238_p2), 24576   ;;  %vm349_vm3 = vsmask.f32 (!%p238_p2), 256  ;;  %v692_v1 = vrot.slane (!%p238_p2), %v4590_v0, 2  ;;  %v4625_v2 = vmov (!%p238_p2), 0  }
   0x7   : > { %342 = vst.msk [vmem:[#allocation2] sm:$0xf] (!%p238_p2), %vm341_vm1, %v4625_v2  ;;  %vm4681_vm4 = vmand (!%p238_p2), %vm343_vm2, %vm349_vm3  ;;  %v354_v4 = vld [vmem:[#allocation2 + $0x8] sm:$0x1] (!%p238_p2)  ;;  %vm381_vm5 = vsmask.f32 (!%p238_p2), 7938 }
   0x8   : > { %344 = vst.msk [vmem:[#allocation2 + $0x4] sm:$0x1] (!%p238_p2), %vm343_vm2, %v4625_v2  ;;  %347 = vst.msk [vmem:[#allocation2 + $0x4c] sm:$0x1] (!%p238_p2), %vm343_vm2, %v4625_v2  ;;  %v355_v5 = vsel (!%p238_p2), %vm4681_vm4, 0, %v354_v4  ;;  %4563 = vmatprep.subr.msk.bf16.mxu0 (!%p238_p2), %vm706_vm0, %v692_v1  ;;  %v708_v8 = vsel (!%p238_p2), %vm706_vm0, %v692_v1, 0 }
   0x9   : > { %346 = vst.msk [vmem:[#allocation2 + $0x48] sm:$0xf] (!%p238_p2), %vm341_vm1, %v4625_v2  ;;  %vm4693_vm6 = vmand (!%p238_p2), %vm343_vm2, %vm381_vm5  ;;  %v386_v7 = vld [vmem:[#allocation2 + $0xc] sm:$0x1] (!%p238_p2)  ;;  %v4704_v10 = vld [vmem:[%s5651_s1] sm:$0x3] (!%p238_p2)  ;;  %4256 = vmatpush3.bf16.msra.mxu0 (!%p238_p2), %v708_v8 }
   0xa   : > { %356 = vst [vmem:[#allocation2 + $0x8] sm:$0x1] (!%p238_p2), %v355_v5  ;;  %v387_v9 = vsel (!%p238_p2), %vm4693_vm6, 0, %v386_v7  ;;  %v357_v11 = vld [vmem:[#allocation2 + $0x10] sm:$0x1] (!%p238_p2)  ;;  %4564 = vmatprep.subr.msk.bf16.mxu0 (!%p238_p2), %vm706_vm0, %v4704_v10  ;;  %vm4745_vm9 = vmand (!%p238_p2), %vm341_vm1, %vm381_vm5  ;;  %vm693_vm11 = vcmask (!%p238_p2), 31744  }
   0xb   : > { %388 = vst [vmem:[#allocation2 + $0xc] sm:$0x1] (!%p238_p2), %v387_v9  ;;  %v360_v12 = vld [vmem:[#allocation2 + $0x18] sm:$0x1] (!%p238_p2)  ;;  %v358_v13 = vsel (!%p238_p2), %vm4681_vm4, 0, %v357_v11  ;;  %vm899_vm12 = vcmask (!%p238_p2), 1042432  }
   0xc   : > { %v361_v14 = vsel (!%p238_p2), %vm4681_vm4, 0, %v360_v12  ;;  %359 = vst [vmem:[#allocation2 + $0x10] sm:$0x1] (!%p238_p2), %v358_v13  ;;  %v389_v18 = vld [vmem:[#allocation2 + $0x14] sm:$0x1] (!%p238_p2)  ;;  %vm900_vm13 = vcmask (!%p238_p2), 1046532  }
   0xd   : > { %s5675_s25 = smov (!%p269_p3, %s3912_s25), 1  ;;  %362 = vst [vmem:[#allocation2 + $0x18] sm:$0x1] %v361_v14  ;;  %v392_v19 = vld [vmem:[#allocation2 + $0x1c] sm:$0x1]  ;;  %v390_v39 = vsel %vm4693_vm6, 0, %v389_v18  ;;  %vm4932_vm14 = vmor %vm899_vm12, %vm900_vm13 }
   0xe   : > { %s4155_s30 = sshll.u32 %s5675_s25, 7  ;;  %v351_v25 = vld [vmem:[#allocation2] sm:$0x1]  ;;  %v393_v40 = vsel %vm4693_vm6, 0, %v392_v19  ;;  %391 = vst [vmem:[#allocation2 + $0x14] sm:$0x1] %v390_v39 }
   0xf   : > { %s4710_s10 = scalar_lea.vmem %s5650_s0, %s4155_s30  ;;  %v383_v26 = vld [vmem:[#allocation2 + $0x4] sm:$0x1]  ;;  %v352_v28 = vsel %vm4681_vm4, 0, %v351_v25  ;;  %394 = vst [vmem:[#allocation2 + $0x1c] sm:$0x1] %v393_v40  ;;  %vm2102_vm15 = vcmask 57344  }
  0x10   : > { %v280_v15 = vld [vmem:[%s4710_s10] sm:$0xf]  ;;  %v281_v22 = vld [vmem:[%s4710_s10 + $0x4] sm:$0xf]  ;;  %v282_v23 = vld [vmem:[%s4710_s10 + $0x8] sm:$0xf] }
  0x11   : > { %v3921_v16 = vld [vmem:[%s4710_s10 + $0x20] sm:$0xf]  ;;  %v3922_v27 = vld [vmem:[%s4710_s10 + $0x24] sm:$0xf]  ;;  %v384_v29 = vsel %vm4693_vm6, 0, %v383_v26  ;;  %vm5158_vm1 = vmand %vm2102_vm15, %vm349_vm3  ;;  %vm2480_vm3 = vcmask 1043456  }
  0x12   : > { %v3929_v17 = vld [vmem:[%s4710_s10 + $0x40] sm:$0xf]  ;;  %v297_v20 = vmax.bf16 %v3921_v16, %v280_v15  ;;  %v3923_v30 = vld [vmem:[%s4710_s10 + $0x28] sm:$0xf]  ;;  %v298_v31 = vmax.bf16 %v3922_v27, %v281_v22  ;;  %v3930_v32 = vld [vmem:[%s4710_s10 + $0x44] sm:$0xf] }
  0x13   : > { %v3937_v21 = vld [vmem:[%s4710_s10 + $0x60] sm:$0xf]  ;;  %353 = vst [vmem:[#allocation2] sm:$0x1] %v352_v28  ;;  %385 = vst [vmem:[#allocation2 + $0x4] sm:$0x1] %v384_v29  ;;  %v299_v34 = vmax.bf16 %v3923_v30, %v282_v23 }
  0x14   : > { %v323_v24 = vmax.bf16 %v3937_v21, %v3929_v17  ;;  %v3931_v35 = vld [vmem:[%s4710_s10 + $0x48] sm:$0xf]  ;;  %v3938_v36 = vld [vmem:[%s4710_s10 + $0x64] sm:$0xf]  ;;  %v283_v44 = vld [vmem:[%s4710_s10 + $0xc] sm:$0xf] }
  0x15   : > { %v3939_v37 = vld [vmem:[%s4710_s10 + $0x68] sm:$0xf]  ;;  %v324_v38 = vmax.bf16 %v3938_v36, %v3930_v32  ;;  %v499_v46 = vld [vmem:[#allocation2 + $0xc] sm:$0x1]  ;;  %v284_v48 = vld [vmem:[%s4710_s10 + $0x10] sm:$0xf] }
  0x16   : > { %v331_v33 = vmax.bf16 %v323_v24, %v297_v20  ;;  %v325_v43 = vmax.bf16 %v3939_v37, %v3931_v35  ;;  %v496_v45 = vld [vmem:[#allocation2 + $0x8] sm:$0xf]  ;;  %v3924_v49 = vld [vmem:[%s4710_s10 + $0x2c] sm:$0xf]  ;;  %vm561_vm7 = vsmask.f32 3328  ;;  %vm5171_vm2 = vmand %vm2102_vm15, %vm381_vm5 }
  0x17   : > { %v332_v47 = vmax.bf16 %v324_v38, %v298_v31  ;;  %vm562_vm8 = vsmask.f32 7440  ;;  %v3925_v52 = vld [vmem:[%s4710_s10 + $0x30] sm:$0xf]  ;;  %v3932_v53 = vld [vmem:[%s4710_s10 + $0x4c] sm:$0xf]  ;;  %v300_v57 = vmax.bf16 %v3924_v49, %v283_v44 }
  0x18   : > { %v414_v41 = vshrl.u32 %v331_v33, 16  ;;  %v417_v42 = vshll.u32 %v331_v33, 16  ;;  %v333_v51 = vmax.bf16 %v325_v43, %v299_v34  ;;  %v3933_v58 = vld [vmem:[%s4710_s10 + $0x50] sm:$0xf]  ;;  %v3940_v59 = vld [vmem:[%s4710_s10 + $0x6c] sm:$0xf]  ;;  %v301_v63 = vmax.bf16 %v3925_v52, %v284_v48  ;;  %vm4795_vm10 = vmor %vm561_vm7, %vm562_vm8 }
  0x19   : > { %v422_v55 = vshrl.u32 %v332_v47, 16  ;;  %v425_v56 = vshll.u32 %v332_v47, 16  ;;  %v3941_v0 = vld [vmem:[%s4710_s10 + $0x70] sm:$0xf]  ;;  %v326_v8 = vmax.bf16 %v3940_v59, %v3932_v53  ;;  %v363_v16 = vld [vmem:[#allocation2 + $0x20] sm:$0x1] }
  0x1a   : > { %v416_v50 = vrot.slane %v414_v41, 7  ;;  %v430_v62 = vshrl.u32 %v333_v51, 16  ;;  %v4752_v1 = vld [vmem:[#allocation2] sm:$0xf]  ;;  %v4754_v4 = vld [vmem:[#allocation2 + $0x4] sm:$0x1]  ;;  %v327_v9 = vmax.bf16 %v3941_v0, %v3933_v58 }
  0x1b   : > { %v424_v5 = vrot.slane %v422_v55, 7  ;;  %v433_v7 = vshll.u32 %v333_v51, 16  ;;  %v565_v13 = vshrl.u32 %v4752_v1, 16  ;;  %v568_v14 = vshll.u32 %v4752_v1, 16  ;;  %v502_v15 = vld [vmem:[#allocation2 + $0x10] sm:$0xf] }
  0x1c   : > { %v419_v60 = vor.u32 %v417_v42, %v416_v50  ;;  %v420_v61 = vrot.slane %v416_v50, 4  ;;  %v574_v17 = vshll.u32 %v4754_v4, 16  ;;  %v505_v20 = vld [vmem:[#allocation2 + $0x14] sm:$0x1]  ;;  %v508_v21 = vld [vmem:[#allocation2 + $0x18] sm:$0xf]  ;;  %v334_v27 = vmax.bf16 %v326_v8, %v300_v57 }
  0x1d   : > { %v427_v18 = vor.u32 %v425_v56, %v424_v5  ;;  %v428_v19 = vrot.slane %v424_v5, 4  ;;  %v366_v22 = vld [vmem:[#allocation2 + $0x28] sm:$0x1]  ;;  %v567_v23 = vrot.slane %v565_v13, 4  ;;  %v570_v24 = vrot.slane %v568_v14, 5  ;;  %s4156_s9 = sshll.u32 %s5675_s25, 6 }
  0x1e   : > { %v497_v11 = vsel %vm4745_vm9, %v419_v60, %v496_v45  ;;  %v500_v12 = vsel %vm4681_vm4, %v420_v61, %v499_v46  ;;  %v432_v25 = vrot.slane %v430_v62, 7  ;;  %v511_v26 = vld [vmem:[#allocation2 + $0x1c] sm:$0x1]  ;;  %v4763_v28 = vrot.slane %v574_v17, 5  ;;  %v395_v32 = vld [vmem:[#allocation2 + $0x24] sm:$0x1]  ;;  %s5629_s12 = scalar_lea.vmem %s5657_s7, %s4156_s9 }
  0x1f   : > { %498 = vst [vmem:[#allocation2 + $0x8] sm:$0xf] %v497_v11  ;;  %501 = vst [vmem:[#allocation2 + $0xc] sm:$0x1] %v500_v12  ;;  %v503_v29 = vsel %vm4745_vm9, %v427_v18, %v502_v15  ;;  %v506_v30 = vsel %vm4681_vm4, %v428_v19, %v505_v20  ;;  %v335_v31 = vmax.bf16 %v327_v9, %v301_v63  ;;  %v398_v33 = vld [vmem:[#allocation2 + $0x2c] sm:$0x1] }
  0x20   : > { %v571_v34 = vor.u32 %v570_v24, %v567_v23  ;;  %v435_v35 = vor.u32 %v433_v7, %v432_v25  ;;  %v436_v36 = vrot.slane %v432_v25, 4  ;;  %504 = vst [vmem:[#allocation2 + $0x10] sm:$0xf] %v503_v29  ;;  %507 = vst [vmem:[#allocation2 + $0x14] sm:$0x1] %v506_v30  ;;  %v364_v37 = vsel %vm4681_vm4, 0, %v363_v16 }
  0x21   : > { %365 = vst [vmem:[#allocation2 + $0x20] sm:$0x1] %v364_v37  ;;  %v367_v38 = vsel %vm4681_vm4, 0, %v366_v22  ;;  %v396_v39 = vsel %vm4693_vm6, 0, %v395_v32  ;;  %v399_v40 = vsel %vm4693_vm6, 0, %v398_v33  ;;  %v438_v41 = vshrl.u32 %v334_v27, 16 }
  0x22   : > { %v4778_v42 = vld [vmem:[%s4710_s10 + $0x14] sm:$0xf]  ;;  %v4780_v43 = vrot.slane %v571_v34, 4  ;;  %v509_v44 = vsel %vm4745_vm9, %v435_v35, %v508_v21  ;;  %v512_v45 = vsel %vm4681_vm4, %v436_v36, %v511_v26  ;;  %368 = vst [vmem:[#allocation2 + $0x28] sm:$0x1] %v367_v38  ;;  %v441_v46 = vshll.u32 %v334_v27, 16 }
  0x23   : > { %397 = vst [vmem:[#allocation2 + $0x24] sm:$0x1] %v396_v39  ;;  %400 = vst [vmem:[#allocation2 + $0x2c] sm:$0x1] %v399_v40  ;;  %v4787_v47 = vld [vmem:[%s4710_s10 + $0x18] sm:$0xf] }
  0x24   : > { %v3926_v48 = vld [vmem:[%s4710_s10 + $0x34] sm:$0xf]  ;;  %v4791_v49 = vld [vmem:[%s4710_s10 + $0x38] sm:$0xf]  ;;  %510 = vst [vmem:[#allocation2 + $0x18] sm:$0xf] %v509_v44  ;;  %v577_v63 = vsel %vm4795_vm10, %v4780_v43, %v4763_v28 }
  0x25   : > { %513 = vst [vmem:[#allocation2 + $0x1c] sm:$0x1] %v512_v45  ;;  %v440_v51 = vrot.slane %v438_v41, 7  ;;  %v446_v52 = vshrl.u32 %v335_v31, 16  ;;  %v449_v53 = vshll.u32 %v335_v31, 16  ;;  %v302_v62 = vmax.bf16 %v3926_v48, %v4778_v42 }
  0x26   : > { %v3934_v55 = vld [vmem:[%s4710_s10 + $0x54] sm:$0xf]  ;;  %v4800_v56 = vld [vmem:[#allocation2 + $0x8] sm:$0xf]  ;;  %v4802_v57 = vld [vmem:[#allocation2 + $0xc] sm:$0x1]  ;;  %v303_v14 = vmax.bf16 %v4791_v49, %v4787_v47 }
  0x27   : > { %v3942_v58 = vld [vmem:[%s4710_s10 + $0x74] sm:$0xf]  ;;  %v579_v59 = vshrl.u32 %v4800_v56, 16  ;;  %v582_v60 = vshll.u32 %v4800_v56, 16  ;;  %v588_v61 = vshll.u32 %v4802_v57, 16  ;;  %v443_v0 = vor.u32 %v441_v46, %v440_v51 }
  0x28   : > { %v444_v5 = vrot.slane %v440_v51, 4  ;;  %v448_v7 = vrot.slane %v446_v52, 7  ;;  %v3935_v8 = vld [vmem:[%s4710_s10 + $0x58] sm:$0xf]  ;;  %v4815_v13 = vld [vmem:[#allocation2 + $0x10] sm:$0xf]  ;;  %v328_v15 = vmax.bf16 %v3942_v58, %v3934_v55 }
  0x29   : > { %v3943_v9 = vld [vmem:[%s4710_s10 + $0x78] sm:$0xf]  ;;  %v581_v11 = vrot.slane %v579_v59, 4  ;;  %v584_v12 = vrot.slane %v582_v60, 5  ;;  %v590_v16 = vrot.slane %v588_v61, 5  ;;  %v593_v18 = vshrl.u32 %v4815_v13, 16 }
  0x2a   : > { %v4819_v17 = vld [vmem:[#allocation2 + $0x14] sm:$0x1]  ;;  %v596_v19 = vshll.u32 %v4815_v13, 16  ;;  %v451_v20 = vor.u32 %v449_v53, %v448_v7  ;;  %v452_v23 = vrot.slane %v448_v7, 4  ;;  %v514_v24 = vld [vmem:[#allocation2 + $0x20] sm:$0xf]  ;;  %v329_v26 = vmax.bf16 %v3943_v9, %v3935_v8 }
  0x2b   : > { %v585_v21 = vor.u32 %v584_v12, %v581_v11  ;;  %v602_v22 = vshll.u32 %v4819_v17, 16  ;;  %v517_v25 = vld [vmem:[#allocation2 + $0x24] sm:$0x1]  ;;  %v4824_v27 = vld [vmem:[#allocation2 + $0x18] sm:$0xf]  ;;  %v595_v29 = vrot.slane %v593_v18, 4  ;;  %v515_v31 = vsel %vm4745_vm9, %v443_v0, %v514_v24 }
  0x2c   : > { %v4826_v28 = vld [vmem:[#allocation2 + $0x1c] sm:$0x1]  ;;  %v598_v30 = vrot.slane %v596_v19, 5  ;;  %v518_v32 = vsel %vm4681_vm4, %v444_v5, %v517_v25  ;;  %v369_v33 = vld [vmem:[#allocation2 + $0x30] sm:$0x1]  ;;  %v607_v36 = vshrl.u32 %v4824_v27, 16  ;;  %v336_v39 = vmax.bf16 %v328_v15, %v302_v62 }
  0x2d   : > { %v372_v34 = vld [vmem:[#allocation2 + $0x38] sm:$0x1]  ;;  %v586_v35 = vrot.slane %v585_v21, 4  ;;  %v610_v37 = vshll.u32 %v4824_v27, 16  ;;  %516 = vst [vmem:[#allocation2 + $0x20] sm:$0xf] %v515_v31  ;;  %v337_v58 = vmax.bf16 %v329_v26, %v303_v14 }
  0x2e   : > { %519 = vst [vmem:[#allocation2 + $0x24] sm:$0x1] %v518_v32  ;;  %v520_v38 = vld [vmem:[#allocation2 + $0x28] sm:$0xf]  ;;  %v599_v40 = vor.u32 %v598_v30, %v595_v29  ;;  %v604_v41 = vrot.slane %v602_v22, 5  ;;  %v616_v42 = vshll.u32 %v4826_v28, 16 }
  0x2f   : > { %v521_v43 = vsel %vm4745_vm9, %v451_v20, %v520_v38  ;;  %v523_v44 = vld [vmem:[#allocation2 + $0x2c] sm:$0x1]  ;;  %v401_v45 = vld [vmem:[#allocation2 + $0x34] sm:$0x1]  ;;  %v591_v46 = vsel %vm4795_vm10, %v586_v35, %v590_v16  ;;  %v609_v47 = vrot.slane %v607_v36, 4  ;;  %v612_v48 = vrot.slane %v610_v37, 5 }
  0x30   : > { %522 = vst [vmem:[#allocation2 + $0x28] sm:$0xf] %v521_v43  ;;  %v524_v49 = vsel %vm4681_vm4, %v452_v23, %v523_v44  ;;  %v404_v51 = vld [vmem:[#allocation2 + $0x3c] sm:$0x1]  ;;  %v3945_v52 = vcombine.low %v577_v63, %v591_v46  ;;  %v600_v53 = vrot.slane %v599_v40, 4  ;;  %v618_v55 = vrot.slane %v616_v42, 5 }
  0x31   : > { %525 = vst [vmem:[#allocation2 + $0x2c] sm:$0x1] %v524_v49  ;;  %v613_v59 = vor.u32 %v612_v48, %v609_v47  ;;  %v370_v60 = vsel %vm4681_vm4, 0, %v369_v33  ;;  %v373_v61 = vsel %vm4681_vm4, 0, %v372_v34  ;;  %v402_v62 = vsel %vm4693_vm6, 0, %v401_v45 }
  0x32   : > { %4257 = vmatprep.mubr.msk.bf16.mxu0 %vm693_vm11, %v3945_v52  ;;  %371 = vst [vmem:[#allocation2 + $0x30] sm:$0x1] %v370_v60  ;;  %374 = vst [vmem:[#allocation2 + $0x38] sm:$0x1] %v373_v61  ;;  %v405_v63 = vsel %vm4693_vm6, 0, %v404_v51  ;;  %v454_v0 = vshrl.u32 %v336_v39, 16  ;;  %v605_v7 = vsel %vm4795_vm10, %v600_v53, %v604_v41 }
  0x33   : > { %403 = vst [vmem:[#allocation2 + $0x34] sm:$0x1] %v402_v62  ;;  %v457_v5 = vshll.u32 %v336_v39, 16  ;;  %v614_v8 = vrot.slane %v613_v59, 4  ;;  %v808_v9 = vsel %vm706_vm0, %v4704_v10, 0  ;;  %v462_v11 = vshrl.u32 %v337_v58, 16 }
  0x34   : > { %406 = vst [vmem:[#allocation2 + $0x3c] sm:$0x1] %v405_v63  ;;  %v4854_v12 = vld [vmem:[#allocation2 + $0x20] sm:$0xf]  ;;  %v456_v15 = vrot.slane %v454_v0, 7  ;;  %v465_v16 = vshll.u32 %v337_v58, 16 }
  0x35   : > { %v4856_v14 = vld [vmem:[#allocation2 + $0x24] sm:$0x1]  ;;  %v619_v18 = vsel %vm4795_vm10, %v614_v8, %v618_v55  ;;  %v621_v19 = vshrl.u32 %v4854_v12, 16  ;;  %v624_v20 = vshll.u32 %v4854_v12, 16  ;;  %v464_v25 = vrot.slane %v462_v11, 7 }
  0x36   : > { %v630_v21 = vshll.u32 %v4856_v14, 16  ;;  %v3946_v22 = vcombine.low %v605_v7, %v619_v18  ;;  %v459_v10 = vor.u32 %v457_v5, %v456_v15  ;;  %v460_v24 = vrot.slane %v456_v15, 4  ;;  %v4868_v26 = vld [vmem:[%s5651_s1 + $0x4] sm:$0x3]  ;;  %v287_v59 = vld [vmem:[%s4710_s10 + $0x1c] sm:$0xf] }
  0x37   : > { %v4863_v23 = vld [vmem:[#allocation2 + $0x28] sm:$0xf]  ;;  %v623_v30 = vrot.slane %v621_v19, 4  ;;  %v626_v31 = vrot.slane %v624_v20, 5  ;;  %v467_v35 = vor.u32 %v465_v16, %v464_v25  ;;  %v468_v36 = vrot.slane %v464_v25, 4 }
  0x38   : > { %v4870_v29 = vld [vmem:[#allocation2 + $0x2c] sm:$0x1]  ;;  %v635_v32 = vshrl.u32 %v4863_v23, 16  ;;  %4258 = vmatmul.mubr.msk.bf16.vlgmr.msra.gmra.mrb[0].mxu0 %vm693_vm11, %v3946_v22  ;;  %v638_v33 = vshll.u32 %v4863_v23, 16  ;;  %v632_v41 = vrot.slane %v630_v21, 5 }
  0x39   : > { %v644_v34 = vshll.u32 %v4870_v29, 16  ;;  %4266 = vmatpush3.bf16.msra.mxu0 %v808_v9  ;;  %v627_v37 = vor.u32 %v626_v31, %v623_v30  ;;  %v526_v39 = vld [vmem:[#allocation2 + $0x30] sm:$0xf]  ;;  %v532_v45 = vld [vmem:[#allocation2 + $0x38] sm:$0xf] }
  0x3a   : > { %v637_v38 = vrot.slane %v635_v32, 4  ;;  %v529_v40 = vld [vmem:[#allocation2 + $0x34] sm:$0x1]  ;;  %v640_v42 = vrot.slane %v638_v33, 5  ;;  %v527_v43 = vsel %vm4745_vm9, %v459_v10, %v526_v39  ;;  %4565 = vmatprep.subr.msk.bf16.mxu0 %vm706_vm0, %v4868_v26  ;;  %v533_v48 = vsel %vm4745_vm9, %v467_v35, %v532_v45  ;;  %v3928_v60 = vld [vmem:[%s4710_s10 + $0x3c] sm:$0xf] }
  0x3b   : > { %v530_v44 = vsel %vm4681_vm4, %v460_v24, %v529_v40  ;;  %v535_v46 = vld [vmem:[#allocation2 + $0x3c] sm:$0x1]  ;;  %v628_v47 = vrot.slane %v627_v37, 4  ;;  %528 = vst [vmem:[#allocation2 + $0x30] sm:$0xf] %v527_v43  ;;  %v646_v52 = vrot.slane %v644_v34, 5  ;;  %v304_v15 = vmax.bf16 %v3928_v60, %v287_v59 }
  0x3c   : > { %531 = vst [vmem:[#allocation2 + $0x34] sm:$0x1] %v530_v44  ;;  %v536_v49 = vsel %vm4681_vm4, %v468_v36, %v535_v46  ;;  %v641_v51 = vor.u32 %v640_v42, %v637_v38  ;;  %534 = vst [vmem:[#allocation2 + $0x38] sm:$0xf] %v533_v48  ;;  %v3936_v62 = vld [vmem:[%s4710_s10 + $0x5c] sm:$0xf]  ;;  %v3954_v43 = vcombine.low %v4752_v1, %v4800_v56 }
  0x3d   : > { %537 = vst [vmem:[#allocation2 + $0x3c] sm:$0x1] %v536_v49  ;;  %v633_v53 = vsel %vm4795_vm10, %v628_v47, %v632_v41  ;;  %v3944_v63 = vld [vmem:[%s4710_s10 + $0x7c] sm:$0xf]  ;;  %v375_v24 = vld [vmem:[#allocation2 + $0x40] sm:$0x1]  ;;  %v3955_v1 = vcombine.low %v4815_v13, %v4824_v27 }
  0x3e   : > { %v642_v55 = vrot.slane %v641_v51, 4  ;;  %v330_v16 = vmax.bf16 %v3944_v63, %v3936_v62  ;;  %v376_v36 = vsel %vm4681_vm4, 0, %v375_v24  ;;  %v4594_v48 = vld [vmem:[%s5651_s1 + $0x4] ss:$0 sps:$4 sm:$0xcc]   ;;  %v904_v56 = vrot.slane %v4754_v4, 5 }
  0x3f   : > { %377 = vst [vmem:[#allocation2 + $0x40] sm:$0x1] %v376_v36  ;;  %v875_v51 = vld [vmem:[#allocation2] sm:$0xe]  ;;  %v1067_v60 = vrot.slane %v4594_v48, 2  ;;  %v912_v63 = vrot.slane %v4819_v17, 5 }
  0x40   : > { %v647_v58 = vsel %vm4795_vm10, %v642_v55, %v646_v52  ;;  %v338_v35 = vmax.bf16 %v330_v16, %v304_v15  ;;  %v876_v52 = vld [vmem:[#allocation2 + $0x8] sm:$0xe]  ;;  %v3956_v55 = vcombine.low %v4854_v12, %v4863_v23  ;;  %v3962_v54 = vrot.slane %v875_v51, 9  ;;  %v877_v4 = vld [vmem:[#allocation2 + $0x10] sm:$0xe] }
  0x41   : > { %v3947_v61 = vcombine.low %v633_v53, %v647_v58  ;;  %v908_v53 = vrot.slane %v4802_v57, 5  ;;  %v960_v58 = vsel %vm706_vm0, %v4868_v26, 0  ;;  %v3963_v59 = vrot.slane %v876_v52, 9  ;;  %v878_v12 = vld [vmem:[#allocation2 + $0x18] sm:$0xe] }
  0x42   : > { %v4894_v0 = vld [vmem:[#allocation2 + $0x30] sm:$0xf]  ;;  %v470_v39 = vshrl.u32 %v338_v35, 16  ;;  %v473_v40 = vshll.u32 %v338_v35, 16  ;;  %v905_v13 = vsel %vm4932_vm14, %v3962_v54, %v904_v56  ;;  %v879_v23 = vld [vmem:[#allocation2 + $0x20] sm:$0xe] }
  0x43   : > { %v4896_v5 = vld [vmem:[#allocation2 + $0x34] sm:$0x1]  ;;  %4261 = vmatprep.mubr.msk.bf16.mxu0 %vm693_vm11, %v3947_v61  ;;  %v4899_v7 = vld [vmem:[#allocation2 + $0x38] sm:$0xf]  ;;  %v649_v9 = vshrl.u32 %v4894_v0, 16  ;;  %v652_v11 = vshll.u32 %v4894_v0, 16  ;;  %v909_v27 = vsel %vm4932_vm14, %v3963_v59, %v908_v53 }
  0x44   : > { %v4901_v8 = vld [vmem:[#allocation2 + $0x3c] sm:$0x1]  ;;  %v658_v18 = vshll.u32 %v4896_v5, 16  ;;  %v663_v19 = vshrl.u32 %v4899_v7, 16  ;;  %v666_v20 = vshll.u32 %v4899_v7, 16  ;;  %v472_v44 = vrot.slane %v470_v39, 7 }
  0x45   : > { %v672_v21 = vshll.u32 %v4901_v8, 16  ;;  %v651_v22 = vrot.slane %v649_v9, 4  ;;  %v654_v10 = vrot.slane %v652_v11, 5  ;;  %v407_v61 = vld [vmem:[#allocation2 + $0x44] sm:$0x1]  ;;  %v916_v9 = vrot.slane %v4826_v28, 5 }
  0x46   : > { %v665_v25 = vrot.slane %v663_v19, 4  ;;  %v668_v30 = vrot.slane %v666_v20, 5  ;;  %v660_v32 = vrot.slane %v658_v18, 5  ;;  %v475_v46 = vor.u32 %v473_v40, %v472_v44  ;;  %v538_v47 = vld [vmem:[#allocation2 + $0x40] sm:$0xf] }
  0x47   : > { %v655_v31 = vor.u32 %v654_v10, %v651_v22  ;;  %v674_v34 = vrot.slane %v672_v21, 5  ;;  %v408_v57 = vsel %vm4693_vm6, 0, %v407_v61  ;;  %v880_v26 = vld [vmem:[#allocation2 + $0x28] sm:$0xe]  ;;  %v3957_v11 = vcombine.low %v4894_v0, %v4899_v7  ;;  %v881_v0 = vld [vmem:[#allocation2 + $0x30] sm:$0xe] }
  0x48   : > { %v669_v33 = vor.u32 %v668_v30, %v665_v25  ;;  %v539_v49 = vsel %vm4745_vm9, %v475_v46, %v538_v47  ;;  %409 = vst [vmem:[#allocation2 + $0x44] sm:$0x1] %v408_v57  ;;  %v3970_v15 = vcombine.low %v905_v13, %v909_v27  ;;  %v3964_v16 = vrot.slane %v877_v4, 9  ;;  %v1284_v39 = vld [vmem:[%s5651_s1 + $0x8] sm:$0x3] }
  0x49   : > { %v656_v37 = vrot.slane %v655_v31, 4  ;;  %540 = vst [vmem:[#allocation2 + $0x40] sm:$0xf] %v539_v49  ;;  %v3965_v18 = vrot.slane %v878_v12, 9  ;;  %v3966_v19 = vrot.slane %v879_v23, 9  ;;  %v920_v20 = vrot.slane %v4856_v14, 5 }
  0x4a   : > { %v670_v38 = vrot.slane %v669_v33, 4  ;;  %v3967_v21 = vrot.slane %v880_v26, 9  ;;  %v924_v22 = vrot.slane %v4870_v29, 5  ;;  %v476_v10 = vrot.slane %v472_v44, 4  ;;  %v882_v29 = vld [vmem:[#allocation2 + $0x38] sm:$0xe] }
  0x4b   : > { %v661_v41 = vsel %vm4795_vm10, %v656_v37, %v660_v32  ;;  %v913_v17 = vsel %vm4932_vm14, %v3964_v16, %v912_v63  ;;  %v917_v28 = vsel %vm4932_vm14, %v3965_v18, %v916_v9  ;;  %v921_v24 = vsel %vm4932_vm14, %v3966_v19, %v920_v20  ;;  %v1156_v33 = vld [vmem:[#allocation2 + $0x8] sm:$0xf]  ;;  %v1158_v37 = vld [vmem:[#allocation2 + $0x10] sm:$0xf]  ;;  %v4978_v46 = vld [vmem:[#allocation2 + $0xc] sm:$0x1] }
  0x4c   : > { %v675_v42 = vsel %vm4795_vm10, %v670_v38, %v674_v34  ;;  %v925_v14 = vsel %vm4932_vm14, %v3967_v21, %v924_v22  ;;  %v3971_v30 = vcombine.low %v913_v17, %v917_v28  ;;  %v3968_v31 = vrot.slane %v881_v0, 9  ;;  %v4980_v51 = vld [vmem:[#allocation2 + $0x14] sm:$0x1]  ;;  %v4595_v56 = vld [vmem:[#allocation2 + $0x8] ss:$8 sps:$4 sm:$0xff]  }
  0x4d   : > { %v3948_v45 = vcombine.low %v661_v41, %v675_v42  ;;  %v928_v32 = vrot.slane %v4896_v5, 5  ;;  %v3972_v34 = vcombine.low %v921_v24, %v925_v14  ;;  %v3969_v35 = vrot.slane %v882_v29, 9  ;;  %v378_v42 = vld [vmem:[#allocation2 + $0x48] sm:$0x1]  ;;  %v1162_v53 = vld [vmem:[#allocation2 + $0x20] sm:$0xf] }
  0x4e   : > { %v932_v36 = vrot.slane %v4901_v8, 5  ;;  %v1081_v38 = vsel %vm706_vm0, %v1067_v60, 0  ;;  %v1173_v40 = vshrl.u32 %v1156_v33, 16  ;;  %v1176_v41 = vshll.u32 %v1156_v33, 16  ;;  %v1166_v61 = vld [vmem:[#allocation2 + $0x30] sm:$0xf] }
  0x4f   : > { %4262 = vmatmul.mubr.msk.bf16.gmra.mrb[4].mxu0 %vm693_vm11, %v3948_v45  ;;  %v541_v7 = vld [vmem:[#allocation2 + $0x44] sm:$0x1]  ;;  %v1190_v44 = vshll.u32 %v1158_v37, 16  ;;  %v379_v5 = vsel %vm4681_vm4, 0, %v378_v42  ;;  %v929_v8 = vsel %vm4932_vm14, %v3968_v31, %v928_v32  ;;  %v1196_v54 = vshll.u32 %v4980_v51, 16 }
  0x50   : > { %4267 = vmatprep.mubr.msk.bf16.mxu0 %vm693_vm11, %v3954_v43  ;;  %v542_v25 = vsel %vm4681_vm4, %v476_v10, %v541_v7  ;;  %v1187_v43 = vshrl.u32 %v1158_v37, 16  ;;  %v933_v45 = vsel %vm4932_vm14, %v3969_v35, %v932_v36  ;;  %380 = vst [vmem:[#allocation2 + $0x48] sm:$0x1] %v379_v5  ;;  %v1175_v47 = vrot.slane %v1173_v40, 4  ;;  %v4596_v23 = vld [vmem:[#allocation2 + $0x18] ss:$8 sps:$4 sm:$0xff]  }
  0x51   : > { %543 = vst [vmem:[#allocation2 + $0x44] sm:$0x1] %v542_v25  ;;  %v1178_v48 = vrot.slane %v1176_v41, 5  ;;  %v3973_v49 = vcombine.low %v929_v8, %v933_v45  ;;  %v1192_v52 = vrot.slane %v1190_v44, 5  ;;  %v1215_v13 = vshrl.u32 %v1162_v53, 16 }
  0x52   : > { %v1189_v3 = vrot.slane %v1187_v43, 4  ;;  %v1218_v27 = vshll.u32 %v1162_v53, 16  ;;  %v4989_v12 = vld [vmem:[%s5651_s1 + $0x8] ss:$0 sps:$4 sm:$0xcc]   ;;  %v1243_v9 = vshrl.u32 %v1166_v61, 16 }
  0x53   : > { %v1198_v19 = vrot.slane %v1196_v54, 5  ;;  %v4991_v20 = vld [vmem:[#allocation2 + $0x1c] sm:$0x1]  ;;  %v1217_v17 = vrot.slane %v1215_v13, 4  ;;  %v410_v0 = vld [vmem:[#allocation2 + $0x4c] sm:$0x1] }
  0x54   : > { %v1193_v4 = vor.u32 %v1192_v52, %v1189_v3  ;;  %v1220_v28 = vrot.slane %v1218_v27, 5  ;;  %v1310_v7 = vsel %vm706_vm0, %v1284_v39, 0  ;;  %v1457_v24 = vrot.slane %v4989_v12, 2  ;;  %v4995_v14 = vld [vmem:[#allocation2 + $0x24] sm:$0x1] }
  0x55   : > { %v1168_v29 = vld [vmem:[#allocation2 + $0x38] sm:$0xf]  ;;  %v1245_v31 = vrot.slane %v1243_v9, 4  ;;  %v1170_v33 = vld [vmem:[#allocation2 + $0x40] sm:$0xf]  ;;  %v1210_v35 = vshll.u32 %v4991_v20, 16 }
  0x56   : > { %v1194_v22 = vrot.slane %v1193_v4, 4  ;;  %v5000_v36 = vld [vmem:[#allocation2 + $0x2c] sm:$0x1]  ;;  %v5002_v37 = vld [vmem:[#allocation2 + $0x34] sm:$0x1]  ;;  %v1221_v41 = vor.u32 %v1220_v28, %v1217_v17  ;;  %v1224_v42 = vshll.u32 %v4995_v14, 16 }
  0x57   : > { %4268 = vmatmul.mubr.msk.bf16.vlgmr.msra.gmra.mrb[0].mxu0 %vm693_vm11, %v3955_v1  ;;  %v1160_v1 = vld [vmem:[#allocation2 + $0x18] sm:$0xf]  ;;  %v1257_v43 = vshrl.u32 %v1168_v29, 16  ;;  %v1260_v44 = vshll.u32 %v1168_v29, 16  ;;  %v1271_v5 = vshrl.u32 %v1170_v33, 16  ;;  %v1274_v8 = vshll.u32 %v1170_v33, 16 }
  0x58   : > { %4276 = vmatpush3.bf16.msra.mxu0 %v960_v58  ;;  %4271 = vmatprep.mubr.msk.bf16.mxu0 %vm693_vm11, %v3956_v55  ;;  %v1182_v55 = vshll.u32 %v4978_v46, 16  ;;  %v1179_v58 = vor.u32 %v1178_v48, %v1175_v47  ;;  %v1201_v59 = vshrl.u32 %v1160_v1, 16  ;;  %v1204_v57 = vshll.u32 %v1160_v1, 16  ;;  %v4598_v3 = vld [vmem:[#allocation2 + $0x38] ss:$8 sps:$4 sm:$0xff]  }
  0x59   : > { %4566 = vmatprep.subr.msk.bf16.mxu0 %vm706_vm0, %v1067_v60  ;;  %v1164_v60 = vld [vmem:[#allocation2 + $0x28] sm:$0xf]  ;;  %v1238_v45 = vshll.u32 %v5000_v36, 16  ;;  %v1252_v48 = vshll.u32 %v5002_v37, 16  ;;  %v1226_v53 = vrot.slane %v1224_v42, 5  ;;  %v1262_v54 = vrot.slane %v1260_v44, 5 }
  0x5a   : > { %v1229_v26 = vshrl.u32 %v1164_v60, 16  ;;  %v1232_v63 = vshll.u32 %v1164_v60, 16  ;;  %v1180_v16 = vrot.slane %v1179_v58, 4  ;;  %v1184_v18 = vrot.slane %v1182_v55, 5  ;;  %v5014_v55 = vld [vmem:[#allocation2 + $0x3c] sm:$0x1] }
  0x5b   : > { %v1203_v21 = vrot.slane %v1201_v59, 4  ;;  %v1206_v10 = vrot.slane %v1204_v57, 5  ;;  %v1259_v58 = vrot.slane %v1257_v43, 4  ;;  %v1273_v59 = vrot.slane %v1271_v5, 4  ;;  %v5016_v27 = vld [vmem:[#allocation2 + $0x44] sm:$0x1] }
  0x5c   : > { %v1231_v25 = vrot.slane %v1229_v26, 4  ;;  %v1276_v60 = vrot.slane %v1274_v8, 5  ;;  %v1240_v4 = vrot.slane %v1238_v45, 5  ;;  %v1254_v13 = vrot.slane %v1252_v48, 5  ;;  %2103 = vst.msk [vmem:[#allocation3 + $0x4] sm:$0x1] %vm2102_vm15, %v4625_v2 }
  0x5d   : > { %v1207_v40 = vor.u32 %v1206_v10, %v1203_v21  ;;  %v1419_v43 = vrot.slane %v4991_v20, 5  ;;  %v1423_v5 = vrot.slane %v4995_v14, 5  ;;  %v1391_v20 = vld [vmem:[#allocation2 + $0x38] sm:$0xe]  ;;  %2106 = vst.msk [vmem:[#allocation3 + $0x4c] sm:$0x1] %vm2102_vm15, %v4625_v2 }
  0x5e   : > { %v1277_v9 = vor.u32 %v1276_v60, %v1273_v59  ;;  %v1439_v59 = vrot.slane %v5016_v27, 5  ;;  %v1666_v60 = vld [vmem:[#allocation2 + $0x18] sm:$0xf] }
  0x5f   : > { %4272 = vmatmul.mubr.msk.bf16.gmra.mrb[4].mxu0 %vm693_vm11, %v3957_v11  ;;  %v1246_v11 = vshll.u32 %v1166_v61, 16  ;;  %v1208_v1 = vrot.slane %v1207_v40, 4 }
  0x60   : > { %4277 = vmatprep.mubr.msk.bf16.mxu0 %vm693_vm11, %v3970_v15  ;;  %v4597_v15 = vld [vmem:[#allocation2 + $0x28] ss:$8 sps:$4 sm:$0xff]  }
  0x61   : > { %v1248_v32 = vrot.slane %v1246_v11, 5  ;;  %v1280_v11 = vshll.u32 %v5016_v27, 16  ;;  %v5074_v27 = vld [vmem:[#allocation2 + $0x14] sm:$0x1] }
  0x63   : > { %v1249_v47 = vor.u32 %v1248_v32, %v1245_v31  ;;  %v1415_v31 = vrot.slane %v4980_v51, 5  ;;  %v1555_v32 = vld [vmem:[%s5651_s1 + $0xc] sm:$0x3] }
  0x65   : > { %v1250_v57 = vrot.slane %v1249_v47, 4  ;;  %v1431_v47 = vrot.slane %v5002_v37, 5  ;;  %v4601_v37 = vld [vmem:[%s5651_s1 + $0xc] ss:$0 sps:$4 sm:$0xcc]  }
  0x67   : > { %4278 = vmatmul.mubr.msk.bf16.vlgmr.msra.gmra.mrb[0].mxu0 %vm693_vm11, %v3971_v30  ;;  %v1234_v30 = vrot.slane %v1232_v63, 5  ;;  %v1263_v63 = vor.u32 %v1262_v54, %v1259_v58  ;;  %v1435_v58 = vrot.slane %v5014_v55, 5 }
  0x68   : > { %4286 = vmatpush3.bf16.msra.mxu0 %v1081_v38  ;;  %4281 = vmatprep.mubr.msk.bf16.mxu0 %vm693_vm11, %v3972_v34  ;;  %v1185_v34 = vsel %vm4795_vm10, %v1180_v16, %v1184_v18  ;;  %v411_v38 = vsel %vm4693_vm6, 0, %v410_v0  ;;  %v1255_v16 = vsel %vm4795_vm10, %v1250_v57, %v1254_v13  ;;  %v1385_v18 = vld [vmem:[#allocation2 + $0x8] sm:$0xe]  ;;  %v1278_v0 = vrot.slane %v1277_v9, 4 }
  0x69   : > { %4567 = vmatprep.subr.msk.bf16.mxu0 %vm706_vm0, %v1284_v39  ;;  %v1199_v39 = vsel %vm4795_vm10, %v1194_v22, %v1198_v19  ;;  %412 = vst [vmem:[#allocation2 + $0x4c] sm:$0x1] %v411_v38  ;;  %v1235_v6 = vor.u32 %v1234_v30, %v1231_v25  ;;  %v1386_v19 = vld [vmem:[#allocation2 + $0x10] sm:$0xe]  ;;  %v1471_v22 = vsel %vm706_vm0, %v1457_v24, 0  ;;  %v1264_v28 = vrot.slane %v1263_v63, 4 }
  0x6a   : > { %v3987_v52 = vcombine.low %v1185_v34, %v1199_v39  ;;  %v3995_v29 = vrot.slane %v1385_v18, 9  ;;  %v1411_v25 = vrot.slane %v4978_v46, 5  ;;  %v3996_v30 = vrot.slane %v1386_v19, 9  ;;  %v1387_v34 = vld [vmem:[#allocation2 + $0x18] sm:$0xe] }
  0x6b   : > { %v1236_v61 = vrot.slane %v1235_v6, 4  ;;  %v1389_v38 = vld [vmem:[#allocation2 + $0x28] sm:$0xe]  ;;  %v1390_v39 = vld [vmem:[#allocation2 + $0x30] sm:$0xe]  ;;  %v1427_v6 = vrot.slane %v5000_v36, 5 }
  0x6c   : > { %v1412_v46 = vsel %vm4932_vm14, %v3995_v29, %v1411_v25  ;;  %v1416_v51 = vsel %vm4932_vm14, %v3996_v30, %v1415_v31  ;;  %v3999_v8 = vrot.slane %v1389_v38, 9  ;;  %v4000_v45 = vrot.slane %v1390_v39, 9  ;;  %v1668_v19 = vld [vmem:[#allocation2 + $0x20] sm:$0xf]  ;;  %v1674_v29 = vld [vmem:[#allocation2 + $0x38] sm:$0xf] }
  0x6d   : > { %v4003_v42 = vcombine.low %v1412_v46, %v1416_v51  ;;  %v1712_v30 = vshll.u32 %v1668_v19, 16  ;;  %v1751_v51 = vshrl.u32 %v1674_v29, 16  ;;  %v4603_v38 = vld [vmem:[#allocation2 + $0x30] ss:$8 sps:$4 sm:$0xff]  }
  0x6e   : > { %v1428_v14 = vsel %vm4932_vm14, %v3999_v8, %v1427_v6  ;;  %v1432_v36 = vsel %vm4932_vm14, %v4000_v45, %v1431_v47  ;;  %v1953_v45 = vld [vmem:[%s5651_s1 + $0x10] sm:$0x3]  ;;  %v5088_v47 = vld [vmem:[#allocation2 + $0x2c] sm:$0x1] }
  0x6f   : > { %4282 = vmatmul.mubr.msk.bf16.gmra.mrb[4].mxu0 %vm693_vm11, %v3973_v49  ;;  %v1212_v49 = vrot.slane %v1210_v35, 5  ;;  %v1388_v35 = vld [vmem:[#allocation2 + $0x20] sm:$0xe] }
  0x70   : > { %4287 = vmatprep.mubr.msk.bf16.mxu0 %vm693_vm11, %v4595_v56  ;;  %v1222_v56 = vrot.slane %v1221_v41, 4  ;;  %v3997_v41 = vrot.slane %v1387_v34, 9  ;;  %v3998_v44 = vrot.slane %v1388_v35, 9  ;;  %v1754_v35 = vshll.u32 %v1674_v29, 16 }
  0x71   : > { %v1213_v12 = vsel %vm4795_vm10, %v1208_v1, %v1212_v49  ;;  %v4001_v1 = vrot.slane %v1391_v20, 9 }
  0x72   : > { %v1227_v26 = vsel %vm4795_vm10, %v1222_v56, %v1226_v53  ;;  %v1420_v48 = vsel %vm4932_vm14, %v3997_v41, %v1419_v43  ;;  %v1424_v49 = vsel %vm4932_vm14, %v3998_v44, %v1423_v5  ;;  %v1664_v56 = vld [vmem:[#allocation2 + $0x10] sm:$0xf]  ;;  %v4005_v53 = vcombine.low %v1428_v14, %v1432_v36  ;;  %v5083_v44 = vld [vmem:[#allocation2 + $0x24] sm:$0x1] }
  0x73   : > { %v3988_v21 = vcombine.low %v1213_v12, %v1227_v26  ;;  %v1681_v57 = vshrl.u32 %v1664_v56, 16  ;;  %v1684_v13 = vshll.u32 %v1664_v56, 16  ;;  %v1695_v12 = vshrl.u32 %v1666_v60, 16  ;;  %v5095_v56 = vld [vmem:[#allocation2 + $0x3c] sm:$0x1] }
  0x74   : > { %v1436_v26 = vsel %vm4932_vm14, %v4001_v1, %v1435_v58  ;;  %v1714_v5 = vrot.slane %v1712_v30, 5  ;;  %v1753_v14 = vrot.slane %v1751_v51, 4  ;;  %v1756_v36 = vrot.slane %v1754_v35, 5  ;;  %v5093_v1 = vld [vmem:[#allocation2 + $0x34] sm:$0x1] }
  0x75   : > { %v1683_v63 = vrot.slane %v1681_v57, 4  ;;  %v1686_v9 = vrot.slane %v1684_v13, 5  ;;  %v1897_v35 = vld [vmem:[#allocation2 + $0x10] sm:$0xe] }
  0x77   : > { %4288 = vmatmul.mubr.msk.bf16.vlgmr.msra.gmra.mrb[0].mxu0 %vm693_vm11, %v4596_v23  ;;  %v1266_v23 = vshll.u32 %v5014_v55, 16 }
  0x78   : > { %4296 = vmatpush3.bf16.msra.mxu0 %v1310_v7  ;;  %4291 = vmatprep.mubr.msk.bf16.mxu0 %vm693_vm11, %v4597_v15  ;;  %v1241_v15 = vsel %vm4795_vm10, %v1236_v61, %v1240_v4  ;;  %v1282_v7 = vrot.slane %v1280_v11, 5  ;;  %v1589_v61 = vsel %vm706_vm0, %v1555_v32, 0  ;;  %v1808_v4 = vrot.slane %v4601_v37, 2 }
  0x79   : > { %4568 = vmatprep.subr.msk.bf16.mxu0 %vm706_vm0, %v1457_v24  ;;  %v1268_v10 = vrot.slane %v1266_v23, 5  ;;  %v3989_v17 = vcombine.low %v1241_v15, %v1255_v16  ;;  %v1698_v23 = vshll.u32 %v1666_v60, 16  ;;  %v5076_v15 = vld [vmem:[#allocation2 + $0x1c] sm:$0x1]  ;;  %v1697_v16 = vrot.slane %v1695_v12, 4 }
  0x7a   : > { %v1283_v33 = vsel %vm4795_vm10, %v1278_v0, %v1282_v7  ;;  %v1709_v0 = vshrl.u32 %v1668_v19, 16  ;;  %v1672_v7 = vld [vmem:[#allocation2 + $0x30] sm:$0xf]  ;;  %v1746_v12 = vshll.u32 %v5093_v1, 16  ;;  %v5105_v19 = vld [vmem:[#allocation2 + $0x44] sm:$0x1] }
  0x7b   : > { %v1269_v24 = vsel %vm4795_vm10, %v1264_v28, %v1268_v10  ;;  %v1700_v18 = vrot.slane %v1698_v23, 5  ;;  %v1690_v10 = vshll.u32 %v5074_v27, 16  ;;  %v1704_v28 = vshll.u32 %v5076_v15, 16 }
  0x7c   : > { %v3990_v40 = vcombine.low %v1269_v24, %v1283_v33  ;;  %v1822_v24 = vsel %vm706_vm0, %v1808_v4, 0  ;;  %v4602_v33 = vld [vmem:[#allocation2 + $0x20] ss:$8 sps:$4 sm:$0xff]   ;;  %v1737_v34 = vshrl.u32 %v1672_v7, 16  ;;  %v1740_v46 = vshll.u32 %v1672_v7, 16 }
  0x7d   : > { %v1701_v25 = vor.u32 %v1700_v18, %v1697_v16  ;;  %v1706_v41 = vrot.slane %v1704_v28, 5  ;;  %v1757_v23 = vor.u32 %v1756_v36, %v1753_v14  ;;  %v1899_v36 = vld [vmem:[#allocation2 + $0x20] sm:$0xe] }
  0x7e   : > { %v1742_v20 = vrot.slane %v1740_v46, 5 }
  0x7f   : > { %4292 = vmatmul.mubr.msk.bf16.gmra.mrb[4].mxu0 %vm693_vm11, %v4598_v3  ;;  %v1392_v3 = vld [vmem:[#allocation2 + $0x40] sm:$0xe]  ;;  %v1702_v43 = vrot.slane %v1701_v25, 4  ;;  %v1758_v7 = vrot.slane %v1757_v23, 4  ;;  %v5107_v25 = vld [vmem:[#allocation2 + $0x4c] sm:$0x1] }
  0x80   : > { %4297 = vmatprep.mubr.msk.bf16.mxu0 %vm693_vm11, %v3987_v52  ;;  %v4004_v52 = vcombine.low %v1420_v48, %v1424_v49  ;;  %v4002_v54 = vrot.slane %v1392_v3, 9  ;;  %v1676_v48 = vld [vmem:[#allocation2 + $0x40] sm:$0xf]  ;;  %v1739_v49 = vrot.slane %v1737_v34, 4  ;;  %v1678_v3 = vld [vmem:[#allocation2 + $0x48] sm:$0xf] }
  0x81   : > { %v1765_v60 = vshrl.u32 %v1676_v48, 16  ;;  %v1782_v57 = vshll.u32 %v1678_v3, 16  ;;  %v1788_v34 = vshll.u32 %v5107_v25, 16 }
  0x82   : > { %v1440_v55 = vsel %vm4932_vm14, %v4002_v54, %v1439_v59  ;;  %v1732_v59 = vshll.u32 %v5088_v47, 16  ;;  %v1743_v13 = vor.u32 %v1742_v20, %v1739_v49  ;;  %v1927_v20 = vrot.slane %v5076_v15, 5  ;;  %v1901_v15 = vld [vmem:[#allocation2 + $0x30] sm:$0xe] }
  0x83   : > { %v4006_v11 = vcombine.low %v1436_v26, %v1440_v55  ;;  %v1760_v26 = vshll.u32 %v5095_v56, 16 }
  0x84   : > { %v1734_v18 = vrot.slane %v1732_v59, 5  ;;  %v1744_v28 = vrot.slane %v1743_v13, 4  ;;  %v1931_v59 = vrot.slane %v5083_v44, 5 }
  0x85   : > { %v1762_v29 = vrot.slane %v1760_v26, 5 }
  0x87   : > { %4298 = vmatmul.mubr.msk.bf16.vlgmr.msra.gmra.mrb[0].mxu0 %vm693_vm11, %v3988_v21  ;;  %v4600_v21 = vld [vmem:[#allocation2 + $0x10] ss:$8 sps:$4 sm:$0xff]   ;;  %v1763_v51 = vsel %vm4795_vm10, %v1758_v7, %v1762_v29 }
  0x88   : > { %4306 = vmatpush3.bf16.msra.mxu0 %v1471_v22  ;;  %4301 = vmatprep.mubr.msk.bf16.mxu0 %vm693_vm11, %v3989_v17  ;;  %v1670_v22 = vld [vmem:[#allocation2 + $0x28] sm:$0xf]  ;;  %v1687_v17 = vor.u32 %v1686_v9, %v1683_v63  ;;  %v2112_v29 = vld [vmem:[#allocation3 + $0x8] sm:$0x1] }
  0x89   : > { %4569 = vmatprep.subr.msk.bf16.mxu0 %vm706_vm0, %v1555_v32  ;;  %v1723_v31 = vshrl.u32 %v1670_v22, 16  ;;  %v1726_v32 = vshll.u32 %v1670_v22, 16  ;;  %v4604_v63 = vld [vmem:[#allocation2 + $0x40] ss:$8 sps:$4 sm:$0xff]  }
  0x8a   : > { %v1688_v39 = vrot.slane %v1687_v17, 4  ;;  %v1784_v17 = vrot.slane %v1782_v57, 5  ;;  %v1939_v57 = vrot.slane %v5093_v1, 5 }
  0x8b   : > { %v1725_v8 = vrot.slane %v1723_v31, 4  ;;  %v1728_v6 = vrot.slane %v1726_v32, 5  ;;  %v1774_v31 = vshll.u32 %v5105_v19, 16 }
  0x8d   : > { %v1729_v54 = vor.u32 %v1728_v6, %v1725_v8  ;;  %v1790_v8 = vrot.slane %v1788_v34, 5  ;;  %v4029_v6 = vrot.slane %v1897_v35, 9  ;;  %v2115_v34 = vld [vmem:[#allocation3 + $0x10] sm:$0x1]  ;;  %v2146_v35 = vld [vmem:[#allocation3 + $0x14] sm:$0x1] }
  0x8f   : > { %4302 = vmatmul.mubr.msk.bf16.gmra.mrb[4].mxu0 %vm693_vm11, %v3990_v40  ;;  %v1692_v40 = vrot.slane %v1690_v10, 5  ;;  %v1730_v16 = vrot.slane %v1729_v54, 4 }
  0x90   : > { %4307 = vmatprep.mubr.msk.bf16.mxu0 %vm693_vm11, %v4003_v42  ;;  %v1711_v42 = vrot.slane %v1709_v0, 4  ;;  %v1748_v0 = vrot.slane %v1746_v12, 5  ;;  %v1943_v12 = vrot.slane %v5095_v56, 5 }
  0x91   : > { %v1693_v37 = vsel %vm4795_vm10, %v1688_v39, %v1692_v40  ;;  %v1735_v32 = vsel %vm4795_vm10, %v1730_v16, %v1734_v18  ;;  %v1979_v40 = vsel %vm706_vm0, %v1953_v45, 0  ;;  %v1951_v18 = vrot.slane %v5107_v25, 5  ;;  %v2143_v25 = vld [vmem:[#allocation3 + $0xc] sm:$0x1] }
  0x92   : > { %v1715_v58 = vor.u32 %v1714_v5, %v1711_v42  ;;  %v1749_v46 = vsel %vm4795_vm10, %v1744_v28, %v1748_v0  ;;  %v2149_v28 = vld [vmem:[#allocation3 + $0x1c] sm:$0x1] }
  0x93   : > { %v4022_v42 = vcombine.low %v1749_v46, %v1763_v51  ;;  %v2116_v51 = vsel %vm5158_vm1, 0, %v2115_v34 }
  0x94   : > { %2117 = vst [vmem:[#allocation3 + $0x10] sm:$0x1] %v2116_v51 }
  0x97   : > { %4308 = vmatmul.mubr.msk.bf16.vlgmr.msra.gmra.mrb[0].mxu0 %vm693_vm11, %v4004_v52  ;;  %v1718_v52 = vshll.u32 %v5083_v44, 16  ;;  %v1903_v44 = vld [vmem:[#allocation2 + $0x40] sm:$0xe] }
  0x98   : > { %4316 = vmatpush3.bf16.msra.mxu0 %v1589_v61  ;;  %4311 = vmatprep.mubr.msk.bf16.mxu0 %vm693_vm11, %v4005_v53  ;;  %v1707_v53 = vsel %vm4795_vm10, %v1702_v43, %v1706_v41  ;;  %v1768_v61 = vshll.u32 %v1676_v48, 16  ;;  %v1776_v41 = vrot.slane %v1774_v31, 5  ;;  %v1923_v48 = vrot.slane %v5074_v27, 5 }
  0x99   : > { %4570 = vmatprep.subr.msk.bf16.mxu0 %vm706_vm0, %v1808_v4  ;;  %v1779_v4 = vshrl.u32 %v1678_v3, 16  ;;  %v1720_v55 = vrot.slane %v1718_v52, 5  ;;  %v4020_v9 = vcombine.low %v1693_v37, %v1707_v53  ;;  %v1900_v37 = vld [vmem:[#allocation2 + $0x28] sm:$0xe]  ;;  %v1902_v52 = vld [vmem:[#allocation2 + $0x38] sm:$0xe] }
  0x9a   : > { %v1770_v22 = vrot.slane %v1768_v61, 5  ;;  %v1924_v3 = vsel %vm4932_vm14, %v4029_v6, %v1923_v48  ;;  %v1935_v61 = vrot.slane %v5088_v47, 5  ;;  %v4034_v13 = vrot.slane %v1902_v52, 9  ;;  %v2124_v48 = vld [vmem:[#allocation3 + $0x28] sm:$0x1] }
  0x9b   : > { %v1781_v10 = vrot.slane %v1779_v4, 4  ;;  %v4033_v4 = vrot.slane %v1901_v15, 9  ;;  %v4035_v56 = vrot.slane %v1903_v44, 9  ;;  %v2113_v31 = vsel %vm5158_vm1, 0, %v2112_v29  ;;  %v2127_v15 = vld [vmem:[#allocation3 + $0x30] sm:$0x1] }
  0x9c   : > { %v1944_v1 = vsel %vm4932_vm14, %v4034_v13, %v1943_v12  ;;  %2114 = vst [vmem:[#allocation3 + $0x8] sm:$0x1] %v2113_v31  ;;  %v2158_v52 = vld [vmem:[#allocation3 + $0x34] sm:$0x1]  ;;  %v5230_v12 = vld [vmem:[%s5653_s3] ss:$0 sm:$0xff] }
  0x9d   : > { %v1940_v47 = vsel %vm4932_vm14, %v4033_v4, %v1939_v57  ;;  %v2167_v4 = vld [vmem:[#allocation3 + $0x4c] sm:$0x1] }
  0x9e   : > { %v2168_v57 = vsel %vm5171_vm2, 0, %v2167_v4 }
  0x9f   : > { %4312 = vmatmul.mubr.msk.bf16.gmra.mrb[4].mxu0 %vm693_vm11, %v4006_v11  ;;  %v1716_v11 = vrot.slane %v1715_v58, 4  ;;  %v4031_v58 = vrot.slane %v1899_v36, 9  ;;  %v2164_v36 = vld [vmem:[#allocation3 + $0x44] sm:$0x1]  ;;  %2169 = vst [vmem:[#allocation3 + $0x4c] sm:$0x1] %v2168_v57 }
  0xa0   : > { %4317 = vmatprep.mubr.msk.bf16.mxu0 %vm693_vm11, %v4600_v21  ;;  %v1767_v21 = vrot.slane %v1765_v60, 4  ;;  %v4032_v60 = vrot.slane %v1900_v37, 9  ;;  %v2165_v37 = vsel %vm5171_vm2, 0, %v2164_v36 }
  0xa1   : > { %v1721_v30 = vsel %vm4795_vm10, %v1716_v11, %v1720_v55  ;;  %v1932_v23 = vsel %vm4932_vm14, %v4031_v58, %v1931_v59  ;;  %v1904_v55 = vld [vmem:[#allocation2 + $0x48] sm:$0xe]  ;;  %v1947_v11 = vrot.slane %v5105_v19, 5  ;;  %2166 = vst [vmem:[#allocation3 + $0x44] sm:$0x1] %v2165_v37  ;;  %v2159_v58 = vsel %vm5171_vm2, 0, %v2158_v52 }
  0xa2   : > { %v4021_v39 = vcombine.low %v1721_v30, %v1735_v32  ;;  %v1936_v26 = vsel %vm4932_vm14, %v4032_v60, %v1935_v61  ;;  %v4036_v16 = vrot.slane %v1904_v55, 9  ;;  %v2150_v30 = vsel %vm5171_vm2, 0, %v2149_v28  ;;  %v2121_v32 = vld [vmem:[#allocation3 + $0x20] sm:$0x1]  ;;  %2160 = vst [vmem:[#allocation3 + $0x34] sm:$0x1] %v2159_v58 }
  0xa3   : > { %2151 = vst [vmem:[#allocation3 + $0x1c] sm:$0x1] %v2150_v30  ;;  %v2454_v59 = vld [vmem:[%s5652_s2 + $0x4] sm:$0xf]  ;;  %v5219_v61 = vld [vmem:[%s5652_s2] sm:$0xf] }
  0xa4   : > { %4572 = vmatprep.subr.msk.bf16.mxu1 %vm2480_vm3, %v2454_v59  ;;  %v2482_v60 = vsel %vm2480_vm3, %v2454_v59, 0 }
  0xa5   : > { %4346 = vmatpush3.bf16.msra.mxu1 %v2482_v60 }
  0xa6   : > { %4573 = vmatprep.subr.msk.bf16.mxu1 %vm2480_vm3, %v5219_v61 }
  0xa7   : > { %4318 = vmatmul.mubr.msk.bf16.vlgmr.msra.gmra.mrb[0].mxu0 %vm693_vm11, %v4602_v33  ;;  %v1785_v33 = vor.u32 %v1784_v17, %v1781_v10  ;;  %v2118_v17 = vld [vmem:[#allocation3 + $0x18] sm:$0x1] }
  0xa8   : > { %4326 = vmatpush3.bf16.msra.mxu0 %v1822_v24  ;;  %4321 = vmatprep.mubr.msk.bf16.mxu0 %vm693_vm11, %v4603_v38  ;;  %v1771_v24 = vor.u32 %v1770_v22, %v1767_v21  ;;  %v1898_v38 = vld [vmem:[#allocation2 + $0x18] sm:$0xe]  ;;  %v1948_v21 = vsel %vm4932_vm14, %v4035_v56, %v1947_v11  ;;  %v1952_v22 = vsel %vm4932_vm14, %v4036_v16, %v1951_v18  ;;  %v2119_v0 = vsel %vm5158_vm1, 0, %v2118_v17 }
  0xa9   : > { %4571 = vmatprep.subr.msk.bf16.mxu0 %vm706_vm0, %v1953_v45  ;;  %v1786_v5 = vrot.slane %v1785_v33, 4  ;;  %v4030_v49 = vrot.slane %v1898_v38, 9  ;;  %v4040_v10 = vcombine.low %v1948_v21, %v1952_v22  ;;  %vm2100_vm0 = vcmask 60416   ;;  %2120 = vst [vmem:[#allocation3 + $0x18] sm:$0x1] %v2119_v0 }
  0xaa   : > { %v1772_v43 = vrot.slane %v1771_v24, 4  ;;  %2101 = vst.msk [vmem:[#allocation3] sm:$0xf] %vm2100_vm0, %v4625_v2  ;;  %2105 = vst.msk [vmem:[#allocation3 + $0x48] sm:$0xf] %vm2100_vm0, %v4625_v2  ;;  %v2144_v2 = vsel %vm5171_vm2, 0, %v2143_v25 }
  0xab   : > { %v1791_v45 = vsel %vm4795_vm10, %v1786_v5, %v1790_v8  ;;  %v1928_v27 = vsel %vm4932_vm14, %v4030_v49, %v1927_v20  ;;  %2145 = vst [vmem:[#allocation3 + $0xc] sm:$0x1] %v2144_v2  ;;  %v2122_v24 = vsel %vm5158_vm1, 0, %v2121_v32  ;;  %v2152_v33 = vld [vmem:[#allocation3 + $0x24] sm:$0x1]  ;;  %v2147_v38 = vsel %vm5171_vm2, 0, %v2146_v35  ;;  %vm5261_vm4 = vmand %vm2100_vm0, %vm381_vm5 }
  0xac   : > { %v1777_v14 = vsel %vm4795_vm10, %v1772_v43, %v1776_v41  ;;  %v4037_v54 = vcombine.low %v1924_v3, %v1928_v27  ;;  %2123 = vst [vmem:[#allocation3 + $0x20] sm:$0x1] %v2122_v24  ;;  %v2153_v46 = vsel %vm5171_vm2, 0, %v2152_v33  ;;  %2148 = vst [vmem:[#allocation3 + $0x14] sm:$0x1] %v2147_v38  ;;  %v2125_v20 = vsel %vm5158_vm1, 0, %v2124_v48 }
  0xad   : > { %v4023_v53 = vcombine.low %v1777_v14, %v1791_v45  ;;  %2154 = vst [vmem:[#allocation3 + $0x24] sm:$0x1] %v2153_v46  ;;  %v2130_v43 = vld [vmem:[#allocation3 + $0x38] sm:$0x1]  ;;  %v2161_v8 = vld [vmem:[#allocation3 + $0x3c] sm:$0x1] }
  0xae   : > { %v2131_v5 = vsel %vm5158_vm1, 0, %v2130_v43  ;;  %v2162_v6 = vsel %vm5171_vm2, 0, %v2161_v8  ;;  %v2155_v49 = vld [vmem:[#allocation3 + $0x2c] sm:$0x1]  ;;  %2126 = vst [vmem:[#allocation3 + $0x28] sm:$0x1] %v2125_v20 }
  0xaf   : > { %4322 = vmatmul.mubr.msk.bf16.gmra.mrb[4].mxu0 %vm693_vm11, %v4604_v63  ;;  %v4038_v63 = vcombine.low %v1932_v23, %v1936_v26  ;;  %2132 = vst [vmem:[#allocation3 + $0x38] sm:$0x1] %v2131_v5  ;;  %2163 = vst [vmem:[#allocation3 + $0x3c] sm:$0x1] %v2162_v6  ;;  %v2156_v14 = vsel %vm5171_vm2, 0, %v2155_v49  ;;  %vm2467_vm5 = vcmask 64512  }
  0xb0   : > { %4327 = vmatprep.mubr.msk.bf16.mxu0 %vm693_vm11, %v4020_v9  ;;  %v4039_v9 = vcombine.low %v1940_v47, %v1944_v1  ;;  %2157 = vst [vmem:[#allocation3 + $0x2c] sm:$0x1] %v2156_v14  ;;  %v2133_v45 = vld [vmem:[#allocation3 + $0x40] sm:$0x1]  ;;  %v2140_v3 = vld [vmem:[#allocation3 + $0x4] sm:$0x1] }
  0xb1   : > { %v2134_v27 = vsel %vm5158_vm1, 0, %v2133_v45  ;;  %v5235_v23 = vld [vmem:[%s5654_s4] ss:$0 sm:$0xff]  ;;  %v2277_v48 = vld [vmem:[#allocation3 + $0x8] sm:$0xf] }
  0xb2   : > { %2135 = vst [vmem:[#allocation3 + $0x40] sm:$0x1] %v2134_v27  ;;  %v2280_v27 = vld [vmem:[#allocation3 + $0xc] sm:$0x1] }
  0xb3   : > { %v2295_v59 = vld [vmem:[#allocation3 + $0x20] sm:$0xf] }
  0xb7   : > { %4328 = vmatmul.mubr.msk.bf16.vlgmr.msra.gmra.mrb[0].mxu0 %vm693_vm11, %v4021_v39  ;;  %v2109_v39 = vld [vmem:[#allocation3] sm:$0x1] }
  0xb8   : > { %4336 = vmatpush3.bf16.msra.mxu0 %v1979_v40  ;;  %4331 = vmatprep.mubr.msk.bf16.mxu0 %vm693_vm11, %v4022_v42  ;;  %v2136_v40 = vld [vmem:[#allocation3 + $0x48] sm:$0x1]  ;;  %v2110_v41 = vsel %vm5158_vm1, 0, %v2109_v39  ;;  %v2289_v39 = vld [vmem:[#allocation3 + $0x18] sm:$0xf] }
  0xb9   : > { %v2137_v42 = vsel %vm5158_vm1, 0, %v2136_v40  ;;  %2111 = vst [vmem:[#allocation3] sm:$0x1] %v2110_v41  ;;  %v2292_v40 = vld [vmem:[#allocation3 + $0x1c] sm:$0x1] }
  0xba   : > { %2138 = vst [vmem:[#allocation3 + $0x48] sm:$0x1] %v2137_v42 }
  0xbf   : > { %4332 = vmatmul.mubr.msk.bf16.gmra.mrb[4].mxu0 %vm693_vm11, %v4023_v53  ;;  %v2128_v53 = vsel %vm5158_vm1, 0, %v2127_v15 }
  0xc0   : > { %4337 = vmatprep.mubr.msk.bf16.mxu0 %vm693_vm11, %v4037_v54  ;;  %v2141_v54 = vsel %vm5171_vm2, 0, %v2140_v3  ;;  %2129 = vst [vmem:[#allocation3 + $0x30] sm:$0x1] %v2128_v53  ;;  %v5225_v13 = vld [vmem:[#allocation3] sm:$0xf] }
  0xc1   : > { %2142 = vst [vmem:[#allocation3 + $0x4] sm:$0x1] %v2141_v54  ;;  %v2343_v44 = vshrl.u32 %v5225_v13, 16  ;;  %v2346_v47 = vshll.u32 %v5225_v13, 16 }
  0xc3   : > { %v5245_v22 = vrot.slane %v2343_v44, 4 }
  0xc7   : > { %4338 = vmatmul.mubr.msk.bf16.vlgmr.msra.gmra.mrb[0].mxu0 %vm693_vm11, %v4038_v63 }
  0xc8   : > { %4341 = vmatprep.mubr.msk.bf16.mxu0 %vm693_vm11, %v4039_v9  ;;  %v5251_v30 = vld [vmem:[#allocation3 + $0x4] sm:$0x1] }
  0xc9   : > { %v2352_v33 = vshll.u32 %v5251_v30, 16 }
  0xcf   : > { %4342 = vmatmul.mubr.msk.bf16.gmra.mrb[4].mxu0 %vm693_vm11, %v4040_v10  ;;  %v5247_v10 = vrot.slane %v2346_v47, 5 }
  0xd1   : > { %v2349_v24 = vor.u32 %v5247_v10, %v5245_v22 }
 0x19a   : > { %v4339_v26 = vpop.f32.mrb[0].mxu0 }
 0x19b   : > { %v2062_v1 = vmul.f32 %v4339_v26, %v5230_v12  ;;  %v2015_v55 = vpop.f32.mrb[1].mxu0  ;;  %v2298_v26 = vld [vmem:[#allocation3 + $0x24] sm:$0x1] }
 0x19c   : > { %v2060_v63 = vmul.f32 %v5230_v12, %v2015_v55  ;;  %v4340_v56 = vpop.f32.mrb[2].mxu0 }
 0x19d   : > { %v2076_v9 = vadd.f32 %v5235_v23, %v2062_v1  ;;  %v2063_v11 = vmul.f32 %v4340_v56, %v5230_v12  ;;  %v2018_v16 = vpop.f32.mrb[3].mxu0 }
 0x19e   : > { %v2074_v18 = vadd.f32 %v5235_v23, %v2060_v63  ;;  %v2061_v21 = vmul.f32 %v5230_v12, %v2018_v16 }
 0x19f   : > { %v2084_v17 = vmax.f32 %v2076_v9, 0.0  ;;  %v2077_v28 = vadd.f32 %v5235_v23, %v2063_v11  ;;  %v2283_v9 = vld [vmem:[#allocation3 + $0x10] sm:$0xf]  ;;  %v2286_v11 = vld [vmem:[#allocation3 + $0x14] sm:$0x1] }
 0x1a0   : > { %v2082_v0 = vmax.f32 %v2074_v18, 0.0  ;;  %v2075_v7 = vadd.f32 %v5235_v23, %v2061_v21 }
 0x1a1   : > { %v4159_v29 = vpack.c.bf16 %v2084_v17, %v2084_v17  ;;  %v2085_v25 = vmax.f32 %v2077_v28, 0.0 }
 0x1a2   : > { %v4157_v31 = vpack.c.bf16 %v2082_v0, %v2082_v0  ;;  %v2083_v2 = vmax.f32 %v2075_v7, 0.0  ;;  %v4343_v32 = vpop.f32.mrb[4].mxu0 }
 0x1a3   : > { %v2211_v34 = vshrl.u32 %v4159_v29, 16  ;;  %v2214_v46 = vshll.u32 %v4159_v29, 16  ;;  %v4160_v51 = vpack.c.bf16 %v2085_v25, %v2085_v25  ;;  %v2066_v35 = vmul.f32 %v4343_v32, %v5230_v12  ;;  %v2031_v38 = vpop.f32.mrb[5].mxu0 }
 0x1a4   : > { %v2195_v41 = vshrl.u32 %v4157_v31, 16  ;;  %v2198_v42 = vshll.u32 %v4157_v31, 16  ;;  %v4158_v43 = vpack.c.bf16 %v2083_v2, %v2083_v2  ;;  %v2064_v5 = vmul.f32 %v5230_v12, %v2031_v38  ;;  %v4344_v8 = vpop.f32.mrb[6].mxu0 }
 0x1a5   : > { %v2213_v6 = vrot.slane %v2211_v34, 7  ;;  %v2219_v49 = vshrl.u32 %v4160_v51, 16  ;;  %v2222_v20 = vshll.u32 %v4160_v51, 16  ;;  %v2080_v14 = vadd.f32 %v5235_v23, %v2066_v35  ;;  %v2034_v45 = vpop.f32.mrb[7].mxu0  ;;  %v2313_v51 = vld [vmem:[#allocation3 + $0x38] sm:$0xf] }
 0x1a6   : > { %v2197_v3 = vrot.slane %v2195_v41, 7  ;;  %v2203_v37 = vshrl.u32 %v4158_v43, 16  ;;  %v2206_v15 = vshll.u32 %v4158_v43, 16  ;;  %v2078_v52 = vadd.f32 %v5235_v23, %v2064_v5 }
 0x1a7   : > { %v2216_v53 = vor.u32 %v2214_v46, %v2213_v6  ;;  %v2217_v58 = vrot.slane %v2213_v6, 4  ;;  %v2221_v54 = vrot.slane %v2219_v49, 7  ;;  %v2088_v60 = vmax.f32 %v2080_v14, 0.0  ;;  %v2304_v6 = vld [vmem:[#allocation3 + $0x2c] sm:$0x1] }
 0x1a8   : > { %v2200_v4 = vor.u32 %v2198_v42, %v2197_v3  ;;  %v2201_v57 = vrot.slane %v2197_v3, 4  ;;  %v2205_v44 = vrot.slane %v2203_v37, 7  ;;  %v2086_v47 = vmax.f32 %v2078_v52, 0.0  ;;  %v2316_v42 = vld [vmem:[#allocation3 + $0x3c] sm:$0x1] }
 0x1a9   : > { %v2290_v1 = vsel %vm5261_vm4, %v2216_v53, %v2289_v39  ;;  %v2293_v55 = vsel %vm5158_vm1, %v2217_v58, %v2292_v40  ;;  %v2224_v63 = vor.u32 %v2222_v20, %v2221_v54  ;;  %v2225_v56 = vrot.slane %v2221_v54, 4 }
 0x1aa   : > { %2291 = vst [vmem:[#allocation3 + $0x18] sm:$0xf] %v2290_v1  ;;  %2294 = vst [vmem:[#allocation3 + $0x1c] sm:$0x1] %v2293_v55  ;;  %v2278_v16 = vsel %vm5261_vm4, %v2200_v4, %v2277_v48  ;;  %v2281_v18 = vsel %vm5158_vm1, %v2201_v57, %v2280_v27  ;;  %v2208_v21 = vor.u32 %v2206_v15, %v2205_v44  ;;  %v2209_v17 = vrot.slane %v2205_v44, 4 }
 0x1ab   : > { %2279 = vst [vmem:[#allocation3 + $0x8] sm:$0xf] %v2278_v16  ;;  %2282 = vst [vmem:[#allocation3 + $0xc] sm:$0x1] %v2281_v18  ;;  %v2296_v28 = vsel %vm5261_vm4, %v2224_v63, %v2295_v59  ;;  %v2299_v0 = vsel %vm5158_vm1, %v2225_v56, %v2298_v26  ;;  %v4163_v7 = vpack.c.bf16 %v2088_v60, %v2088_v60  ;;  %v5289_v39 = vrot.slane %v2349_v24, 4 }
 0x1ac   : > { %v4161_v29 = vpack.c.bf16 %v2086_v47, %v2086_v47  ;;  %2297 = vst [vmem:[#allocation3 + $0x20] sm:$0xf] %v2296_v28  ;;  %2300 = vst [vmem:[#allocation3 + $0x24] sm:$0x1] %v2299_v0  ;;  %v2284_v25 = vsel %vm5261_vm4, %v2208_v21, %v2283_v9  ;;  %v2287_v31 = vsel %vm5158_vm1, %v2209_v17, %v2286_v11  ;;  %v5293_v40 = vrot.slane %v2352_v33, 5 }
 0x1ad   : > { %v2067_v2 = vmul.f32 %v4344_v8, %v5230_v12  ;;  %v2065_v32 = vmul.f32 %v5230_v12, %v2034_v45  ;;  %2285 = vst [vmem:[#allocation3 + $0x10] sm:$0xf] %v2284_v25  ;;  %2288 = vst [vmem:[#allocation3 + $0x14] sm:$0x1] %v2287_v31  ;;  %v2243_v34 = vshrl.u32 %v4163_v7, 16  ;;  %v2246_v12 = vshll.u32 %v4163_v7, 16 }
 0x1ae   : > { %v2227_v46 = vshrl.u32 %v4161_v29, 16  ;;  %v2230_v5 = vshll.u32 %v4161_v29, 16  ;;  %v2301_v8 = vld [vmem:[#allocation3 + $0x28] sm:$0xf]  ;;  %v2355_v27 = vsel %vm4795_vm10, %v5289_v39, %v5293_v40  ;;  %v2319_v57 = vld [vmem:[#allocation3 + $0x40] sm:$0xf] }
 0x1af   : > { %v2081_v35 = vadd.f32 %v5235_v23, %v2067_v2  ;;  %v2079_v38 = vadd.f32 %v5235_v23, %v2065_v32  ;;  %v2245_v41 = vrot.slane %v2243_v34, 7  ;;  %v2322_v26 = vld [vmem:[#allocation3 + $0x44] sm:$0x1]  ;;  %v2307_v47 = vld [vmem:[#allocation3 + $0x30] sm:$0xf] }
 0x1b0   : > { %v2229_v43 = vrot.slane %v2227_v46, 7  ;;  %v2310_v16 = vld [vmem:[#allocation3 + $0x34] sm:$0x1] }
 0x1b1   : > { %v2089_v48 = vmax.f32 %v2081_v35, 0.0  ;;  %v2087_v49 = vmax.f32 %v2079_v38, 0.0  ;;  %v2248_v20 = vor.u32 %v2246_v12, %v2245_v41  ;;  %v2249_v23 = vrot.slane %v2245_v41, 4  ;;  %v5295_v22 = vld [vmem:[#allocation3 + $0x18] sm:$0xf] }
 0x1b2   : > { %v2232_v14 = vor.u32 %v2230_v5, %v2229_v43  ;;  %v2233_v45 = vrot.slane %v2229_v43, 4  ;;  %v5297_v3 = vld [vmem:[#allocation3 + $0x8] sm:$0xf]  ;;  %v5299_v33 = vld [vmem:[#allocation3 + $0xc] sm:$0x1]  ;;  %v2385_v4 = vshrl.u32 %v5295_v22, 16 }
 0x1b3   : > { %v4164_v10 = vpack.c.bf16 %v2089_v48, %v2089_v48  ;;  %v4162_v24 = vpack.c.bf16 %v2087_v49, %v2087_v49  ;;  %v2314_v37 = vsel %vm5261_vm4, %v2248_v20, %v2313_v51  ;;  %v2317_v15 = vsel %vm5158_vm1, %v2249_v23, %v2316_v42  ;;  %v5323_v0 = vld [vmem:[#allocation3 + $0x1c] sm:$0x1]  ;;  %v5327_v34 = vld [vmem:[#allocation3 + $0x20] sm:$0xf] }
 0x1b4   : > { %v2302_v52 = vsel %vm5261_vm4, %v2232_v14, %v2301_v8  ;;  %v2305_v53 = vsel %vm5158_vm1, %v2233_v45, %v2304_v6  ;;  %2315 = vst [vmem:[#allocation3 + $0x38] sm:$0xf] %v2314_v37  ;;  %2318 = vst [vmem:[#allocation3 + $0x3c] sm:$0x1] %v2317_v15  ;;  %v5313_v60 = vld [vmem:[#allocation3 + $0x10] sm:$0xf] }
 0x1b5   : > { %2303 = vst [vmem:[#allocation3 + $0x28] sm:$0xf] %v2302_v52  ;;  %2306 = vst [vmem:[#allocation3 + $0x2c] sm:$0x1] %v2305_v53  ;;  %v2251_v58 = vshrl.u32 %v4164_v10, 16  ;;  %v2254_v54 = vshll.u32 %v4164_v10, 16 }
 0x1b6   : > { %v2235_v59 = vshrl.u32 %v4162_v24, 16  ;;  %v2238_v44 = vshll.u32 %v4162_v24, 16  ;;  %v2357_v1 = vshrl.u32 %v5297_v3, 16  ;;  %v2360_v55 = vshll.u32 %v5297_v3, 16  ;;  %v5319_v56 = vld [vmem:[#allocation3 + $0x14] sm:$0x1] }
 0x1b7   : > { %v2366_v63 = vshll.u32 %v5299_v33, 16  ;;  %v2253_v9 = vrot.slane %v2251_v58, 7  ;;  %v2371_v18 = vshrl.u32 %v5313_v60, 16  ;;  %v2374_v21 = vshll.u32 %v5313_v60, 16  ;;  %v5343_v10 = vld [vmem:[#allocation3 + $0x24] sm:$0x1] }
 0x1b8   : > { %v2237_v11 = vrot.slane %v2235_v59, 7  ;;  %v2359_v17 = vrot.slane %v2357_v1, 4  ;;  %v2362_v28 = vrot.slane %v2360_v55, 5  ;;  %v2380_v7 = vshll.u32 %v5319_v56, 16 }
 0x1b9   : > { %v2388_v29 = vshll.u32 %v5295_v22, 16  ;;  %v2256_v25 = vor.u32 %v2254_v54, %v2253_v9  ;;  %v2257_v31 = vrot.slane %v2253_v9, 4  ;;  %v2368_v51 = vrot.slane %v2366_v63, 5 }
 0x1ba   : > { %v2240_v2 = vor.u32 %v2238_v44, %v2237_v11  ;;  %v2241_v32 = vrot.slane %v2237_v11, 4  ;;  %v2363_v46 = vor.u32 %v2362_v28, %v2359_v17  ;;  %v2373_v35 = vrot.slane %v2371_v18, 4  ;;  %v2705_v28 = vld [vmem:[%s5652_s2 + $0x8] sm:$0xf] }
 0x1bb   : > { %v2376_v38 = vrot.slane %v2374_v21, 5  ;;  %v2320_v41 = vsel %vm5261_vm4, %v2256_v25, %v2319_v57  ;;  %v2323_v12 = vsel %vm5158_vm1, %v2257_v31, %v2322_v26  ;;  %v2387_v6 = vrot.slane %v2385_v4, 4  ;;  %v5346_v37 = vld [vmem:[#allocation3 + $0x38] sm:$0xf]  ;;  %v5363_v40 = vld [vmem:[#allocation3 + $0x3c] sm:$0x1] }
 0x1bc   : > { %v2308_v42 = vsel %vm5261_vm4, %v2240_v2, %v2307_v47  ;;  %v2311_v43 = vsel %vm5158_vm1, %v2241_v32, %v2310_v16  ;;  %2321 = vst [vmem:[#allocation3 + $0x40] sm:$0xf] %v2320_v41  ;;  %2324 = vst [vmem:[#allocation3 + $0x44] sm:$0x1] %v2323_v12  ;;  %v2364_v5 = vrot.slane %v2363_v46, 4  ;;  %v2390_v48 = vrot.slane %v2388_v29, 5 }
 0x1bd   : > { %2309 = vst [vmem:[#allocation3 + $0x30] sm:$0xf] %v2308_v42  ;;  %2312 = vst [vmem:[#allocation3 + $0x34] sm:$0x1] %v2311_v43  ;;  %v2377_v8 = vor.u32 %v2376_v38, %v2373_v35  ;;  %v2382_v49 = vrot.slane %v2380_v7, 5  ;;  %v2394_v20 = vshll.u32 %v5323_v0, 16 }
 0x1be   : > { %v5338_v23 = vld [vmem:[#allocation3 + $0x28] sm:$0xf]  ;;  %v2399_v36 = vshrl.u32 %v5327_v34, 16  ;;  %v2369_v19 = vsel %vm4795_vm10, %v2364_v5, %v2368_v51  ;;  %v2391_v45 = vor.u32 %v2390_v48, %v2387_v6  ;;  %v2402_v24 = vshll.u32 %v5327_v34, 16  ;;  %v5355_v59 = vld [vmem:[#allocation3 + $0x2c] sm:$0x1] }
 0x1bf   : > { %v2378_v14 = vrot.slane %v2377_v8, 4  ;;  %v4055_v15 = vcombine.low %v2355_v27, %v2369_v19  ;;  %v2396_v52 = vrot.slane %v2394_v20, 5  ;;  %v2413_v57 = vshrl.u32 %v5338_v23, 16 }
 0x1c0   : > { %v2401_v53 = vrot.slane %v2399_v36, 4  ;;  %v2392_v54 = vrot.slane %v2391_v45, 4  ;;  %v2404_v4 = vrot.slane %v2402_v24, 5  ;;  %v2582_v26 = vsel %vm2480_vm3, %v5219_v61, 0  ;;  %v2649_v24 = vld [vmem:[#allocation3] sm:$0xe] }
 0x1c1   : > { %v2383_v58 = vsel %vm4795_vm10, %v2378_v14, %v2382_v49  ;;  %4347 = vmatprep.mubr.msk.bf16.mxu1 %vm2467_vm5, %v4055_v15  ;;  %v2408_v44 = vshll.u32 %v5343_v10, 16  ;;  %v2416_v39 = vshll.u32 %v5338_v23, 16  ;;  %v2441_v27 = vshrl.u32 %v5346_v37, 16  ;;  %v2650_v15 = vld [vmem:[#allocation3 + $0x8] sm:$0xe] }
 0x1c2   : > { %v2397_v47 = vsel %vm4795_vm10, %v2392_v54, %v2396_v52  ;;  %v2405_v1 = vor.u32 %v2404_v4, %v2401_v53  ;;  %v2415_v55 = vrot.slane %v2413_v57, 4  ;;  %v2444_v63 = vshll.u32 %v5346_v37, 16  ;;  %v2814_v54 = vld [vmem:[%s5652_s2 + $0xc] sm:$0xf] }
 0x1c3   : > { %v4056_v9 = vcombine.low %v2383_v58, %v2397_v47  ;;  %v2418_v11 = vrot.slane %v2416_v39, 5  ;;  %v2422_v16 = vshll.u32 %v5355_v59, 16  ;;  %v2443_v25 = vrot.slane %v2441_v27, 4  ;;  %v2653_v27 = vld [vmem:[#allocation3 + $0x20] sm:$0xe] }
 0x1c4   : > { %v2331_v61 = vld [vmem:[#allocation3 + $0x30] sm:$0xf]  ;;  %v5370_v18 = vld [vmem:[#allocation3 + $0x34] sm:$0x1]  ;;  %v2406_v7 = vrot.slane %v2405_v1, 4  ;;  %v2446_v31 = vrot.slane %v2444_v63, 5  ;;  %v4063_v45 = vcombine.low %v5225_v13, %v5297_v3  ;;  %v4064_v52 = vcombine.low %v5313_v60, %v5295_v22 }
 0x1c5   : > { %v2427_v21 = vshrl.u32 %v2331_v61, 16  ;;  %v2430_v17 = vshll.u32 %v2331_v61, 16  ;;  %4348 = vmatmul.mubr.msk.bf16.vlgmr.msra.gmra.mrb[0].mxu1 %vm2467_vm5, %v4056_v9  ;;  %v2419_v29 = vor.u32 %v2418_v11, %v2415_v55  ;;  %v2436_v46 = vshll.u32 %v5370_v18, 16 }
 0x1c6   : > { %4356 = vmatpush3.bf16.msra.mxu1 %v2582_v26  ;;  %v2450_v51 = vshll.u32 %v5363_v40, 16  ;;  %v2410_v35 = vrot.slane %v2408_v44, 5  ;;  %v2424_v41 = vrot.slane %v2422_v16, 5  ;;  %v2447_v12 = vor.u32 %v2446_v31, %v2443_v25  ;;  %v2655_v16 = vld [vmem:[#allocation3 + $0x30] sm:$0xe] }
 0x1c7   : > { %v2429_v2 = vrot.slane %v2427_v21, 4  ;;  %v2432_v32 = vrot.slane %v2430_v17, 5  ;;  %v2420_v38 = vrot.slane %v2419_v29, 4  ;;  %4574 = vmatprep.subr.msk.bf16.mxu1 %vm2480_vm3, %v2705_v28  ;;  %v2438_v49 = vrot.slane %v2436_v46, 5  ;;  %v2656_v17 = vld [vmem:[#allocation3 + $0x38] sm:$0xe] }
 0x1c8   : > { %v2411_v43 = vsel %vm4795_vm10, %v2406_v7, %v2410_v35  ;;  %v2448_v8 = vrot.slane %v2447_v12, 4  ;;  %v2452_v20 = vrot.slane %v2450_v51, 5  ;;  %v2731_v53 = vsel %vm2480_vm3, %v2705_v28, 0  ;;  %v3051_v29 = vld [vmem:[%s5652_s2 + $0x10] sm:$0xf] }
 0x1c9   : > { %v2433_v42 = vor.u32 %v2432_v32, %v2429_v2  ;;  %v2425_v5 = vsel %vm4795_vm10, %v2420_v38, %v2424_v41  ;;  %v4065_v58 = vcombine.low %v5327_v34, %v5338_v23  ;;  %v2675_v13 = vrot.slane %v5251_v30, 5  ;;  %v2651_v34 = vld [vmem:[#allocation3 + $0x10] sm:$0xe]  ;;  %v2654_v23 = vld [vmem:[#allocation3 + $0x28] sm:$0xe] }
 0x1ca   : > { %v4057_v6 = vcombine.low %v2411_v43, %v2425_v5  ;;  %v2453_v19 = vsel %vm4795_vm10, %v2448_v8, %v2452_v20  ;;  %v2679_v3 = vrot.slane %v5299_v33, 5  ;;  %v4071_v4 = vrot.slane %v2649_v24, 9  ;;  %v2652_v33 = vld [vmem:[#allocation3 + $0x18] sm:$0xe]  ;;  %v2925_v2 = vld [vmem:[#allocation3 + $0x10] sm:$0xf] }
 0x1cb   : > { %v2434_v48 = vrot.slane %v2433_v42, 4  ;;  %v4072_v57 = vrot.slane %v2650_v15, 9  ;;  %v4066_v30 = vcombine.low %v2331_v61, %v5346_v37  ;;  %v2683_v26 = vrot.slane %v5319_v56, 5  ;;  %v2923_v46 = vld [vmem:[#allocation3 + $0x8] sm:$0xf] }
 0x1cc   : > { %4351 = vmatprep.mubr.msk.bf16.mxu1 %vm2467_vm5, %v4057_v6  ;;  %v2676_v22 = vsel %vm4932_vm14, %v4071_v4, %v2675_v13  ;;  %v4073_v39 = vrot.slane %v2651_v34, 9  ;;  %v4076_v47 = vrot.slane %v2654_v23, 9  ;;  %v2695_v1 = vrot.slane %v5355_v59, 5  ;;  %v4609_v42 = vld [vmem:[#allocation3 + $0x8] ss:$8 sps:$4 sm:$0xff]  }
 0x1cd   : > { %v2439_v36 = vsel %vm4795_vm10, %v2434_v48, %v2438_v49  ;;  %v2680_v60 = vsel %vm4932_vm14, %v4072_v57, %v2679_v3  ;;  %v2687_v55 = vrot.slane %v5323_v0, 5  ;;  %v4074_v63 = vrot.slane %v2652_v33, 9  ;;  %v2929_v5 = vld [vmem:[#allocation3 + $0x20] sm:$0xf]  ;;  %v2933_v8 = vld [vmem:[#allocation3 + $0x30] sm:$0xf] }
 0x1ce   : > { %v4058_v14 = vcombine.low %v2439_v36, %v2453_v19  ;;  %v4079_v44 = vcombine.low %v2676_v22, %v2680_v60  ;;  %v4075_v9 = vrot.slane %v2653_v27, 9  ;;  %v2691_v11 = vrot.slane %v5343_v10, 5  ;;  %v2927_v49 = vld [vmem:[#allocation3 + $0x18] sm:$0xf]  ;;  %v5439_v20 = vld [vmem:[#allocation3 + $0x14] sm:$0x1] }
 0x1cf   : > { %v2684_v37 = vsel %vm4932_vm14, %v4073_v39, %v2683_v26  ;;  %v2696_v56 = vsel %vm4932_vm14, %v4076_v47, %v2695_v1  ;;  %v2688_v61 = vsel %vm4932_vm14, %v4074_v63, %v2687_v55  ;;  %v2848_v59 = vsel %vm2480_vm3, %v2814_v54, 0  ;;  %v4610_v13 = vld [vmem:[#allocation3 + $0x18] ss:$8 sps:$4 sm:$0xff]   ;;  %v4611_v60 = vld [vmem:[#allocation3 + $0x28] ss:$8 sps:$4 sm:$0xff]  }
 0x1d0   : > { %4352 = vmatmul.mubr.msk.bf16.gmra.mrb[4].mxu1 %vm2467_vm5, %v4058_v14  ;;  %v4080_v21 = vcombine.low %v2684_v37, %v2688_v61  ;;  %v2692_v0 = vsel %vm4932_vm14, %v4075_v9, %v2691_v11  ;;  %v4077_v7 = vrot.slane %v2655_v16, 9  ;;  %v2699_v10 = vrot.slane %v5370_v18, 5  ;;  %v2931_v14 = vld [vmem:[#allocation3 + $0x28] sm:$0xf]  ;;  %v5448_v34 = vld [vmem:[%s5652_s2 + $0x14] sm:$0xf] }
 0x1d1   : > { %4357 = vmatprep.mubr.msk.bf16.mxu1 %vm2467_vm5, %v4063_v45  ;;  %v4081_v28 = vcombine.low %v2692_v0, %v2696_v56  ;;  %v4078_v25 = vrot.slane %v2656_v17, 9  ;;  %v2703_v31 = vrot.slane %v5363_v40, 5  ;;  %v2954_v18 = vshrl.u32 %v2925_v2, 16  ;;  %v2937_v27 = vld [vmem:[#allocation3 + $0x40] sm:$0xf] }
 0x1d2   : > { %v2700_v32 = vsel %vm4932_vm14, %v4077_v7, %v2699_v10  ;;  %v2957_v51 = vshll.u32 %v2925_v2, 16  ;;  %v2940_v41 = vshrl.u32 %v2923_v46, 16  ;;  %v2943_v12 = vshll.u32 %v2923_v46, 16  ;;  %v5453_v47 = vld [vmem:[#allocation3 + $0x24] sm:$0x1] }
 0x1d3   : > { %v2704_v35 = vsel %vm4932_vm14, %v4078_v25, %v2703_v31  ;;  %v2956_v43 = vrot.slane %v2954_v18, 4  ;;  %v2982_v36 = vshrl.u32 %v2929_v5, 16  ;;  %v2985_v19 = vshll.u32 %v2929_v5, 16  ;;  %v2935_v56 = vld [vmem:[#allocation3 + $0x38] sm:$0xf] }
 0x1d4   : > { %v4082_v38 = vcombine.low %v2700_v32, %v2704_v35  ;;  %v2959_v40 = vrot.slane %v2957_v51, 5  ;;  %v2942_v6 = vrot.slane %v2940_v41, 4  ;;  %v2945_v48 = vrot.slane %v2943_v12, 5  ;;  %v5457_v16 = vld [vmem:[#allocation3 + $0x1c] sm:$0x1] }
 0x1d5   : > { %v3010_v24 = vshrl.u32 %v2933_v8, 16  ;;  %v3013_v15 = vshll.u32 %v2933_v8, 16  ;;  %v2963_v4 = vshll.u32 %v5439_v20, 16  ;;  %v2996_v57 = vshrl.u32 %v2931_v14, 16  ;;  %v5464_v25 = vld [vmem:[#allocation3 + $0x2c] sm:$0x1] }
 0x1d6   : > { %v2960_v45 = vor.u32 %v2959_v40, %v2956_v43  ;;  %v2946_v3 = vor.u32 %v2945_v48, %v2942_v6  ;;  %v2999_v22 = vshll.u32 %v2931_v14, 16  ;;  %v2984_v23 = vrot.slane %v2982_v36, 4  ;;  %v4612_v32 = vld [vmem:[#allocation3 + $0x38] ss:$8 sps:$4 sm:$0xff]  }
 0x1d7   : > { %v3015_v39 = vrot.slane %v3013_v15, 5  ;;  %v2965_v9 = vrot.slane %v2963_v4, 5  ;;  %v2998_v11 = vrot.slane %v2996_v57, 4  ;;  %v3041_v0 = vshll.u32 %v2937_v27, 16  ;;  %v3153_v4 = vld [vmem:[#allocation3 + $0x10] sm:$0xe] }
 0x1d8   : > { %4358 = vmatmul.mubr.msk.bf16.vlgmr.msra.gmra.mrb[0].mxu1 %vm2467_vm5, %v4064_v52  ;;  %v3077_v52 = vsel %vm2480_vm3, %v3051_v29, 0  ;;  %v2961_v26 = vrot.slane %v2960_v45, 4  ;;  %v2947_v63 = vrot.slane %v2946_v3, 4  ;;  %v3001_v37 = vrot.slane %v2999_v22, 5 }
 0x1d9   : > { %4366 = vmatpush3.bf16.msra.mxu1 %v2731_v53  ;;  %4361 = vmatprep.mubr.msk.bf16.mxu1 %vm2467_vm5, %v4065_v58  ;;  %v5442_v53 = vld [vmem:[#allocation3 + $0xc] sm:$0x1]  ;;  %v2968_v58 = vshrl.u32 %v2927_v49, 16  ;;  %v3024_v31 = vshrl.u32 %v2935_v56, 16  ;;  %v3027_v2 = vshll.u32 %v2935_v56, 16  ;;  %v2977_v18 = vshll.u32 %v5457_v16, 16 }
 0x1da   : > { %4575 = vmatprep.subr.msk.bf16.mxu1 %vm2480_vm3, %v2814_v54  ;;  %v2971_v54 = vshll.u32 %v2927_v49, 16  ;;  %v2949_v33 = vshll.u32 %v5442_v53, 16  ;;  %v3002_v51 = vor.u32 %v3001_v37, %v2998_v11  ;;  %v3005_v43 = vshll.u32 %v5464_v25, 16  ;;  %v3155_v56 = vld [vmem:[#allocation3 + $0x20] sm:$0xe] }
 0x1db   : > { %v2970_v1 = vrot.slane %v2968_v58, 4  ;;  %v3026_v6 = vrot.slane %v3024_v31, 4  ;;  %v3029_v48 = vrot.slane %v3027_v2, 5  ;;  %v2979_v14 = vrot.slane %v2977_v18, 5  ;;  %v5479_v58 = vld [vmem:[#allocation3 + $0x3c] sm:$0x1] }
 0x1dc   : > { %v2973_v55 = vrot.slane %v2971_v54, 5  ;;  %v2951_v17 = vrot.slane %v2949_v33, 5  ;;  %v3003_v49 = vrot.slane %v3002_v51, 4  ;;  %v3007_v15 = vrot.slane %v3005_v43, 5 }
 0x1dd   : > { %v3234_v22 = vsel %vm2480_vm3, %v5448_v34, 0  ;;  %v3194_v18 = vrot.slane %v5464_v25, 5 }
 0x1de   : > { %v2974_v10 = vor.u32 %v2973_v55, %v2970_v1  ;;  %v2952_v46 = vsel %vm4795_vm10, %v2947_v63, %v2951_v17  ;;  %v3178_v63 = vrot.slane %v5442_v53, 5  ;;  %v3154_v17 = vld [vmem:[#allocation3 + $0x18] sm:$0xe] }
 0x1df   : > { %v4105_v2 = vrot.slane %v3154_v17, 9 }
 0x1e0   : > { %4362 = vmatmul.mubr.msk.bf16.gmra.mrb[4].mxu1 %vm2467_vm5, %v4066_v30  ;;  %v2987_v30 = vrot.slane %v2985_v19, 5  ;;  %v2975_v5 = vrot.slane %v2974_v10, 4  ;;  %v5473_v19 = vld [vmem:[#allocation3 + $0x44] sm:$0x1]  ;;  %v3156_v10 = vld [vmem:[#allocation3 + $0x28] sm:$0xe] }
 0x1e1   : > { %4367 = vmatprep.mubr.msk.bf16.mxu1 %vm2467_vm5, %v4079_v44  ;;  %v3012_v44 = vrot.slane %v3010_v24, 4  ;;  %v3047_v3 = vshll.u32 %v5473_v19, 16  ;;  %v3206_v25 = vrot.slane %v5473_v19, 5 }
 0x1e2   : > { %v2988_v61 = vor.u32 %v2987_v30, %v2984_v23  ;;  %v2980_v54 = vsel %vm4795_vm10, %v2975_v5, %v2979_v14  ;;  %v3033_v30 = vshll.u32 %v5479_v58, 16 }
 0x1e3   : > { %v3016_v7 = vor.u32 %v3015_v39, %v3012_v44  ;;  %v3318_v44 = vld [vmem:[%s5652_s2 + $0x18] sm:$0xf]  ;;  %v4104_v39 = vrot.slane %v3153_v4, 9  ;;  %v3049_v1 = vrot.slane %v3047_v3, 5  ;;  %v3435_v3 = vld [vmem:[#allocation3 + $0x30] sm:$0xf] }
 0x1e4   : > { %v2989_v41 = vrot.slane %v2988_v61, 4  ;;  %v3157_v61 = vld [vmem:[#allocation3 + $0x30] sm:$0xe] }
 0x1e5   : > { %v3017_v40 = vrot.slane %v3016_v7, 4  ;;  %v3190_v7 = vrot.slane %v5453_v47, 5 }
 0x1e8   : > { %4368 = vmatmul.mubr.msk.bf16.vlgmr.msra.gmra.mrb[0].mxu1 %vm2467_vm5, %v4080_v21  ;;  %v5459_v21 = vld [vmem:[#allocation3 + $0x34] sm:$0x1] }
 0x1e9   : > { %4376 = vmatpush3.bf16.msra.mxu1 %v2848_v59  ;;  %4371 = vmatprep.mubr.msk.bf16.mxu1 %vm2467_vm5, %v4081_v28  ;;  %v3038_v59 = vshrl.u32 %v2937_v27, 16  ;;  %v2966_v28 = vsel %vm4795_vm10, %v2961_v26, %v2965_v9  ;;  %v3019_v35 = vshll.u32 %v5459_v21, 16  ;;  %v3152_v26 = vld [vmem:[#allocation3 + $0x8] sm:$0xe]  ;;  %v3182_v27 = vrot.slane %v5439_v20, 5 }
 0x1ea   : > { %4576 = vmatprep.subr.msk.bf16.mxu1 %vm2480_vm3, %v3051_v29  ;;  %v2991_v29 = vshll.u32 %v5453_v47, 16  ;;  %v4103_v55 = vrot.slane %v3152_v26, 9  ;;  %v3035_v9 = vrot.slane %v3033_v30, 5  ;;  %v3198_v31 = vrot.slane %v5459_v21, 5 }
 0x1eb   : > { %v3040_v12 = vrot.slane %v3038_v59, 4  ;;  %v3021_v36 = vrot.slane %v3019_v35, 5  ;;  %v3183_v37 = vsel %vm4932_vm14, %v4104_v39, %v3182_v27  ;;  %v3159_v35 = vld [vmem:[#allocation3 + $0x40] sm:$0xe]  ;;  %v3352_v21 = vsel %vm2480_vm3, %v3318_v44, 0 }
 0x1ec   : > { %v2993_v8 = vrot.slane %v2991_v29, 5  ;;  %v4108_v29 = vrot.slane %v3157_v61, 9  ;;  %v4110_v43 = vrot.slane %v3159_v35, 9  ;;  %v3503_v39 = vshll.u32 %v3435_v3, 16  ;;  %v3441_v27 = vld [vmem:[#allocation3 + $0x48] sm:$0xf] }
 0x1ed   : > { %v4615_v61 = vld [vmem:[#allocation3 + $0x30] ss:$8 sps:$4 sm:$0xff]  }
 0x1ee   : > { %v2994_v45 = vsel %vm4795_vm10, %v2989_v41, %v2993_v8  ;;  %v3199_v47 = vsel %vm4932_vm14, %v4108_v29, %v3198_v31  ;;  %v3202_v8 = vrot.slane %v5479_v58, 5  ;;  %v3439_v29 = vld [vmem:[#allocation3 + $0x40] sm:$0xf] }
 0x1ef   : > { %v4096_v57 = vcombine.low %v2980_v54, %v2994_v45 }
 0x1f0   : > { %4372 = vmatmul.mubr.msk.bf16.gmra.mrb[4].mxu1 %vm2467_vm5, %v4082_v38  ;;  %v4095_v38 = vcombine.low %v2952_v46, %v2966_v28  ;;  %v4106_v28 = vrot.slane %v3155_v56, 9  ;;  %v4107_v46 = vrot.slane %v3156_v10, 9  ;;  %v3505_v10 = vrot.slane %v3503_v39, 5 }
 0x1f1   : > { %4377 = vmatprep.mubr.msk.bf16.mxu1 %vm2467_vm5, %v4609_v42  ;;  %v3043_v42 = vrot.slane %v3041_v0, 5  ;;  %v3179_v0 = vsel %vm4932_vm14, %v4103_v55, %v3178_v63 }
 0x1f2   : > { %v4111_v53 = vcombine.low %v3179_v0, %v3183_v37  ;;  %v3191_v51 = vsel %vm4932_vm14, %v4106_v28, %v3190_v7 }
 0x1f3   : > { %v3044_v24 = vor.u32 %v3043_v42, %v3040_v12  ;;  %v3195_v12 = vsel %vm4932_vm14, %v4107_v46, %v3194_v18  ;;  %v3545_v46 = vshll.u32 %v3441_v27, 16 }
 0x1f4   : > { %v4113_v42 = vcombine.low %v3195_v12, %v3199_v47  ;;  %v5550_v47 = vld [vmem:[#allocation3 + $0x2c] sm:$0x1]  ;;  %v5554_v12 = vld [vmem:[#allocation3 + $0x34] sm:$0x1] }
 0x1f5   : > { %v3045_v33 = vrot.slane %v3044_v24, 4  ;;  %v3698_v50 = vrot.slane %v5554_v12, 5 }
 0x1f7   : > { %v3050_v11 = vsel %vm4795_vm10, %v3045_v33, %v3049_v1  ;;  %v3437_v33 = vld [vmem:[#allocation3 + $0x38] sm:$0xf]  ;;  %v5537_v1 = vld [vmem:[#allocation3 + $0x1c] sm:$0x1] }
 0x1f8   : > { %4378 = vmatmul.mubr.msk.bf16.vlgmr.msra.gmra.mrb[0].mxu1 %vm2467_vm5, %v4610_v13  ;;  %v3030_v13 = vor.u32 %v3029_v48, %v3026_v6  ;;  %v3427_v6 = vld [vmem:[#allocation3 + $0x10] sm:$0xf]  ;;  %v3207_v48 = vsel %vm4932_vm14, %v4110_v43, %v3206_v25  ;;  %v3514_v56 = vshrl.u32 %v3437_v33, 16  ;;  %v3467_v28 = vshll.u32 %v5537_v1, 16 }
 0x1f9   : > { %4386 = vmatpush3.bf16.msra.mxu1 %v3077_v52  ;;  %4381 = vmatprep.mubr.msk.bf16.mxu1 %vm2467_vm5, %v4611_v60  ;;  %v3022_v52 = vsel %vm4795_vm10, %v3017_v40, %v3021_v36  ;;  %v3008_v60 = vsel %vm4795_vm10, %v3003_v49, %v3007_v15  ;;  %v3555_v40 = vld [vmem:[%s5652_s2 + $0x1c] sm:$0xf]  ;;  %v3429_v49 = vld [vmem:[#allocation3 + $0x18] sm:$0xf]  ;;  %v3444_v36 = vshrl.u32 %v3427_v6, 16  ;;  %v3447_v19 = vshll.u32 %v3427_v6, 16 }
 0x1fa   : > { %4577 = vmatprep.subr.msk.bf16.mxu1 %vm2480_vm3, %v5448_v34  ;;  %v4097_v23 = vcombine.low %v3008_v60, %v3022_v52  ;;  %v3031_v34 = vrot.slane %v3030_v13, 4  ;;  %v3458_v24 = vshrl.u32 %v3429_v49, 16  ;;  %v3461_v15 = vshll.u32 %v3429_v49, 16  ;;  %v4613_v52 = vld [vmem:[#allocation3 + $0x10] ss:$8 sps:$4 sm:$0xff]  }
 0x1fb   : > { %v3446_v54 = vrot.slane %v3444_v36, 4  ;;  %v3449_v58 = vrot.slane %v3447_v19, 5  ;;  %v3433_v13 = vld [vmem:[#allocation3 + $0x28] sm:$0xf]  ;;  %v5534_v60 = vld [vmem:[#allocation3 + $0x14] sm:$0x1] }
 0x1fc   : > { %v3036_v20 = vsel %vm4795_vm10, %v3031_v34, %v3035_v9  ;;  %v3460_v4 = vrot.slane %v3458_v24, 4  ;;  %v3489_v30 = vshll.u32 %v3433_v13, 16  ;;  %v3581_v34 = vsel %vm2480_vm3, %v3555_v40, 0  ;;  %v4614_v9 = vld [vmem:[#allocation3 + $0x20] ss:$8 sps:$4 sm:$0xff]  }
 0x1fd   : > { %v4098_v59 = vcombine.low %v3036_v20, %v3050_v11  ;;  %v3450_v26 = vor.u32 %v3449_v58, %v3446_v54  ;;  %v3453_v11 = vshll.u32 %v5534_v60, 16  ;;  %v3517_v20 = vshll.u32 %v3437_v33, 16  ;;  %v5559_v6 = vld [vmem:[#allocation3 + $0x3c] sm:$0x1]  ;;  %v4616_v36 = vld [vmem:[#allocation3 + $0x40] ss:$8 sps:$4 sm:$0xff]  }
 0x1fe   : > { %v3491_v17 = vrot.slane %v3489_v30, 5  ;;  %v3516_v35 = vrot.slane %v3514_v56, 4  ;;  %v3469_v25 = vrot.slane %v3467_v28, 5  ;;  %v3547_v49 = vrot.slane %v3545_v46, 5  ;;  %v5568_v30 = vld [vmem:[#allocation3 + $0x44] sm:$0x1] }
 0x1ff   : > { %v3455_v18 = vrot.slane %v3453_v11, 5  ;;  %v5570_v33 = vld [vmem:[#allocation3 + $0x4c] sm:$0x1]  ;;  %v3537_v11 = vshll.u32 %v5568_v30, 16 }
 0x200   : > { %4382 = vmatmul.mubr.msk.bf16.gmra.mrb[4].mxu1 %vm2467_vm5, %v4612_v32  ;;  %v3186_v32 = vrot.slane %v5457_v16, 5  ;;  %v3158_v16 = vld [vmem:[#allocation3 + $0x38] sm:$0xe] }
 0x201   : > { %4387 = vmatprep.mubr.msk.bf16.mxu1 %vm2467_vm5, %v4095_v38  ;;  %v4109_v5 = vrot.slane %v3158_v16, 9  ;;  %v3528_v16 = vshrl.u32 %v3439_v29, 16 }
 0x202   : > { %v3187_v38 = vsel %vm4932_vm14, %v4105_v2, %v3186_v32  ;;  %v3542_v32 = vshrl.u32 %v3441_v27, 16 }
 0x203   : > { %v4112_v41 = vcombine.low %v3187_v38, %v3191_v51  ;;  %v3203_v14 = vsel %vm4932_vm14, %v4109_v5, %v3202_v8  ;;  %v3519_v38 = vrot.slane %v3517_v20, 5  ;;  %v3495_v8 = vshll.u32 %v5550_v47, 16 }
 0x204   : > { %v4114_v45 = vcombine.low %v3203_v14, %v3207_v48  ;;  %v3544_v48 = vrot.slane %v3542_v32, 4  ;;  %v3530_v54 = vrot.slane %v3528_v16, 4 }
 0x205   : > { %v3520_v24 = vor.u32 %v3519_v38, %v3516_v35  ;;  %v3660_v35 = vld [vmem:[#allocation3 + $0x30] sm:$0xe] }
 0x208   : > { %4388 = vmatmul.mubr.msk.bf16.vlgmr.msra.gmra.mrb[0].mxu1 %vm2467_vm5, %v4096_v57  ;;  %v3463_v57 = vrot.slane %v3461_v15, 5 }
 0x209   : > { %4396 = vmatpush3.bf16.msra.mxu1 %v3234_v22  ;;  %4391 = vmatprep.mubr.msk.bf16.mxu1 %vm2467_vm5, %v4097_v23  ;;  %v3431_v22 = vld [vmem:[#allocation3 + $0x20] sm:$0xf]  ;;  %v3486_v23 = vshrl.u32 %v3433_v13, 16 }
 0x20a   : > { %4578 = vmatprep.subr.msk.bf16.mxu1 %vm2480_vm3, %v3318_v44  ;;  %v3500_v44 = vshrl.u32 %v3435_v3, 16  ;;  %v3472_v55 = vshrl.u32 %v3431_v22, 16  ;;  %v3475_v63 = vshll.u32 %v3431_v22, 16  ;;  %v3464_v37 = vor.u32 %v3463_v57, %v3460_v4 }
 0x20b   : > { %v3488_v0 = vrot.slane %v3486_v23, 4  ;;  %v3523_v3 = vshll.u32 %v5559_v6, 16  ;;  %v3497_v57 = vrot.slane %v3495_v8, 5  ;;  %v3521_v23 = vrot.slane %v3520_v24, 4 }
 0x20c   : > { %v3502_v7 = vrot.slane %v3500_v44, 4  ;;  %v3474_v31 = vrot.slane %v3472_v55, 4  ;;  %v3477_v2 = vrot.slane %v3475_v63, 5  ;;  %v3465_v51 = vrot.slane %v3464_v37, 4  ;;  %v3656_v37 = vld [vmem:[#allocation3 + $0x10] sm:$0xe] }
 0x20d   : > { %v3525_v63 = vrot.slane %v3523_v3, 5  ;;  %v4151_v3 = vld [vmem:[%s5655_s5] ss:$0 sm:$0xff] }
 0x20e   : > { %v3478_v5 = vor.u32 %v3477_v2, %v3474_v31  ;;  %v3470_v19 = vsel %vm4795_vm10, %v3465_v51, %v3469_v25  ;;  %v3539_v31 = vrot.slane %v3537_v11, 5  ;;  %v3659_v51 = vld [vmem:[#allocation3 + $0x28] sm:$0xe]  ;;  %v4139_v25 = vrot.slane %v3660_v35, 9 }
 0x210   : > { %4392 = vmatmul.mubr.msk.bf16.gmra.mrb[4].mxu1 %vm2467_vm5, %v4098_v59  ;;  %v5543_v59 = vld [vmem:[%s5652_s2 + $0x20] sm:$0xf]  ;;  %v3479_v4 = vrot.slane %v3478_v5, 4 }
 0x211   : > { %4397 = vmatprep.mubr.msk.bf16.mxu1 %vm2467_vm5, %v4111_v53  ;;  %v3451_v53 = vrot.slane %v3450_v26, 4  ;;  %v3548_v26 = vor.u32 %v3547_v49, %v3544_v48  ;;  %v3738_v20 = vsel %vm2480_vm3, %v5543_v59, 0  ;;  %v3702_v48 = vrot.slane %v5559_v6, 5 }
 0x212   : > { %v3706_v6 = vrot.slane %v5568_v30, 5 }
 0x213   : > { %v3456_v43 = vsel %vm4795_vm10, %v3451_v53, %v3455_v18  ;;  %v3549_v53 = vrot.slane %v3548_v26, 4 }
 0x214   : > { %v4127_v15 = vcombine.low %v3456_v43, %v3470_v19  ;;  %v3661_v43 = vld [vmem:[#allocation3 + $0x38] sm:$0xe]  ;;  %v3662_v19 = vld [vmem:[#allocation3 + $0x40] sm:$0xe] }
 0x215   : > { %v4140_v8 = vrot.slane %v3661_v43, 9 }
 0x218   : > { %4398 = vmatmul.mubr.msk.bf16.vlgmr.msra.gmra.mrb[0].mxu1 %vm2467_vm5, %v4112_v41  ;;  %v5552_v41 = vld [vmem:[#allocation3 + $0x24] sm:$0x1] }
 0x219   : > { %4406 = vmatpush3.bf16.msra.mxu1 %v3352_v21  ;;  %4401 = vmatprep.mubr.msk.bf16.mxu1 %vm2467_vm5, %v4113_v42  ;;  %v3492_v21 = vor.u32 %v3491_v17, %v3488_v0  ;;  %v3531_v42 = vshll.u32 %v3439_v29, 16  ;;  %v3481_v14 = vshll.u32 %v5552_v41, 16  ;;  %v3682_v29 = vrot.slane %v5534_v60, 5 }
 0x21a   : > { %4579 = vmatprep.subr.msk.bf16.mxu1 %vm2480_vm3, %v3555_v40  ;;  %v3506_v40 = vor.u32 %v3505_v10, %v3502_v7  ;;  %v3657_v7 = vld [vmem:[#allocation3 + $0x18] sm:$0xe]  ;;  %v4135_v10 = vrot.slane %v3656_v37, 9  ;;  %v3690_v5 = vrot.slane %v5552_v41, 5 }
 0x21b   : > { %v3533_v58 = vrot.slane %v3531_v42, 5  ;;  %v3483_v44 = vrot.slane %v3481_v14, 5  ;;  %v4136_v2 = vrot.slane %v3657_v7, 9  ;;  %v4138_v42 = vrot.slane %v3659_v51, 9 }
 0x21c   : > { %v3507_v13 = vrot.slane %v3506_v40, 4  ;;  %v3683_v18 = vsel %vm4932_vm14, %v4135_v10, %v3682_v29 }
 0x21d   : > { %v3534_v27 = vor.u32 %v3533_v58, %v3530_v54 }
 0x21f   : > { %v3535_v17 = vrot.slane %v3534_v27, 4 }
 0x220   : > { %4402 = vmatmul.mubr.msk.bf16.gmra.mrb[4].mxu1 %vm2467_vm5, %v4114_v45  ;;  %v3509_v45 = vshll.u32 %v5554_v12, 16 }
 0x221   : > { %4407 = vmatprep.mubr.msk.bf16.mxu1 %vm2467_vm5, %v4613_v52  ;;  %v3493_v52 = vrot.slane %v3492_v21, 4  ;;  %v3540_v32 = vsel %vm4795_vm10, %v3535_v17, %v3539_v31  ;;  %v3658_v21 = vld [vmem:[#allocation3 + $0x20] sm:$0xe] }
 0x222   : > { %v3511_v22 = vrot.slane %v3509_v45, 5  ;;  %v4137_v40 = vrot.slane %v3658_v21, 9  ;;  %v3703_v45 = vsel %vm4932_vm14, %v4140_v8, %v3702_v48 }
 0x223   : > { %v3498_v39 = vsel %vm4795_vm10, %v3493_v52, %v3497_v57  ;;  %v3710_v52 = vrot.slane %v5570_v33, 5 }
 0x224   : > { %v3512_v55 = vsel %vm4795_vm10, %v3507_v13, %v3511_v22  ;;  %v3691_v14 = vsel %vm4932_vm14, %v4137_v40, %v3690_v5 }
 0x228   : > { %4408 = vmatmul.mubr.msk.bf16.vlgmr.msra.gmra.mrb[0].mxu1 %vm2467_vm5, %v4614_v9  ;;  %v3484_v9 = vsel %vm4795_vm10, %v3479_v4, %v3483_v44  ;;  %v4152_v4 = vld [vmem:[%s5656_s6] ss:$0 sm:$0xff] }
 0x229   : > { %4416 = vmatpush3.bf16.msra.mxu1 %v3581_v34  ;;  %4411 = vmatprep.mubr.msk.bf16.mxu1 %vm2467_vm5, %v4615_v61  ;;  %v3551_v34 = vshll.u32 %v5570_v33, 16  ;;  %v4128_v56 = vcombine.low %v3484_v9, %v3498_v39  ;;  %v3526_v61 = vsel %vm4795_vm10, %v3521_v23, %v3525_v63 }
 0x22a   : > { %4580 = vmatprep.subr.msk.bf16.mxu1 %vm2480_vm3, %v5543_v59  ;;  %v4129_v0 = vcombine.low %v3512_v55, %v3526_v61  ;;  %v3686_v59 = vrot.slane %v5537_v1, 5  ;;  %v3694_v1 = vrot.slane %v5550_v47, 5  ;;  %v3699_v47 = vsel %vm4932_vm14, %v4139_v25, %v3698_v50 }
 0x22b   : > { %v3553_v28 = vrot.slane %v3551_v34, 5  ;;  %v4145_v24 = vcombine.low %v3699_v47, %v3703_v45 }
 0x22c   : > { %v3687_v60 = vsel %vm4932_vm14, %v4136_v2, %v3686_v59  ;;  %v3695_v49 = vsel %vm4932_vm14, %v4138_v42, %v3694_v1 }
 0x22d   : > { %v3554_v46 = vsel %vm4795_vm10, %v3549_v53, %v3553_v28  ;;  %v4143_v16 = vcombine.low %v3683_v18, %v3687_v60  ;;  %v4144_v12 = vcombine.low %v3691_v14, %v3695_v49 }
 0x22e   : > { %v4130_v38 = vcombine.low %v3540_v32, %v3554_v46 }
 0x230   : > { %4412 = vmatmul.mubr.msk.bf16.gmra.mrb[4].mxu1 %vm2467_vm5, %v4616_v36  ;;  %v3663_v36 = vld [vmem:[#allocation3 + $0x48] sm:$0xe] }
 0x231   : > { %4417 = vmatprep.mubr.msk.bf16.mxu1 %vm2467_vm5, %v4127_v15  ;;  %v4142_v41 = vrot.slane %v3663_v36, 9  ;;  %v4141_v15 = vrot.slane %v3662_v19, 9 }
 0x233   : > { %v3707_v54 = vsel %vm4932_vm14, %v4141_v15, %v3706_v6  ;;  %v3711_v58 = vsel %vm4932_vm14, %v4142_v41, %v3710_v52 }
 0x234   : > { %v4146_v13 = vcombine.low %v3707_v54, %v3711_v58 }
 0x238   : > { %4418 = vmatmul.mubr.msk.bf16.vlgmr.msra.gmra.mrb[0].mxu1 %vm2467_vm5, %v4128_v56 }
 0x239   : > { %4426 = vmatpush3.bf16.msra.mxu1 %v3738_v20  ;;  %4421 = vmatprep.mubr.msk.bf16.mxu1 %vm2467_vm5, %v4129_v0 }
 0x240   : > { %4422 = vmatmul.mubr.msk.bf16.gmra.mrb[4].mxu1 %vm2467_vm5, %v4130_v38 }
 0x241   : > { %4427 = vmatprep.mubr.msk.bf16.mxu1 %vm2467_vm5, %v4143_v16 }
 0x248   : > { %4428 = vmatmul.mubr.msk.bf16.vlgmr.msra.gmra.mrb[0].mxu1 %vm2467_vm5, %v4144_v12 }
 0x249   : > { %4431 = vmatprep.mubr.msk.bf16.mxu1 %vm2467_vm5, %v4145_v24 }
 0x250   : > { %4432 = vmatmul.mubr.msk.bf16.gmra.mrb[4].mxu1 %vm2467_vm5, %v4146_v13 }
 0x31b   : > { %v4429_v57 = vpop.f32.mrb[0].mxu1 }
 0x31c   : > { %v3821_v22 = vmul.f32 %v4429_v57, %v4151_v3  ;;  %v3774_v23 = vpop.f32.mrb[1].mxu1 }
 0x31d   : > { %v3819_v30 = vmul.f32 %v4151_v3, %v3774_v23  ;;  %v4430_v33 = vpop.f32.mrb[2].mxu1 }
 0x31e   : > { %v3835_v26 = vadd.f32 %v4152_v4, %v3821_v22  ;;  %v3822_v62 = vmul.f32 %v4430_v33, %v4151_v3  ;;  %v3777_v44 = vpop.f32.mrb[3].mxu1 }
 0x31f   : > { %v3833_v39 = vadd.f32 %v4152_v4, %v3819_v30  ;;  %v3820_v27 = vmul.f32 %v4151_v3, %v3777_v44 }
 0x320   : > { %v3843_v34 = vmax.f32 %v3835_v26, 0.0  ;;  %v3836_v55 = vadd.f32 %v4152_v4, %v3822_v62 }
 0x321   : > { %v3841_v63 = vmax.f32 %v3833_v39, 0.0  ;;  %v3834_v9 = vadd.f32 %v4152_v4, %v3820_v27 }
 0x322   : > { %3851 = vst.msk [vmem:[%s5629_s12 + $0x10] sm:$0xff] %vm2467_vm5, %v3843_v34  ;;  %v3844_v11 = vmax.f32 %v3836_v55, 0.0 }
 0x323   : > { %3849 = vst.msk [vmem:[%s5629_s12] sm:$0xff] %vm2467_vm5, %v3841_v63  ;;  %v3842_v37 = vmax.f32 %v3834_v9, 0.0  ;;  %v4433_v56 = vpop.f32.mrb[4].mxu1 }
 0x324   : > { %3852 = vst.msk [vmem:[%s5629_s12 + $0x18] sm:$0xff] %vm2467_vm5, %v3844_v11  ;;  %v3825_v20 = vmul.f32 %v4433_v56, %v4151_v3  ;;  %v3790_v61 = vpop.f32.mrb[5].mxu1 }
 0x325   : > { %3850 = vst.msk [vmem:[%s5629_s12 + $0x8] sm:$0xff] %vm2467_vm5, %v3842_v37  ;;  %v3823_v0 = vmul.f32 %v4151_v3, %v3790_v61  ;;  %v4434_v17 = vpop.f32.mrb[6].mxu1 }
 0x326   : > { %v3839_v53 = vadd.f32 %v4152_v4, %v3825_v20  ;;  %v3826_v28 = vmul.f32 %v4434_v17, %v4151_v3  ;;  %v3793_v7 = vpop.f32.mrb[7].mxu1 }
 0x327   : > { %v3837_v10 = vadd.f32 %v4152_v4, %v3823_v0  ;;  %v3824_v29 = vmul.f32 %v4151_v3, %v3793_v7 }
 0x328   : > { %v3847_v31 = vmax.f32 %v3839_v53, 0.0  ;;  %v3840_v2 = vadd.f32 %v4152_v4, %v3826_v28 }
 0x329   : > { %v3845_v59 = vmax.f32 %v3837_v10, 0.0  ;;  %v3838_v32 = vadd.f32 %v4152_v4, %v3824_v29 }
 0x32a   : > { %3855 = vst.msk [vmem:[%s5629_s12 + $0x30] sm:$0xff] %vm2467_vm5, %v3847_v31  ;;  %v3848_v46 = vmax.f32 %v3840_v2, 0.0 }
 0x32b   : > { %3853 = vst.msk [vmem:[%s5629_s12 + $0x20] sm:$0xff] %vm2467_vm5, %v3845_v59  ;;  %v3846_v18 = vmax.f32 %v3838_v32, 0.0 }
 0x32c   : > { %3856 = vst.msk [vmem:[%s5629_s12 + $0x38] sm:$0xff] %vm2467_vm5, %v3848_v46 }
 0x32d   : > { %3854 = vst.msk [vmem:[%s5629_s12 + $0x28] sm:$0xff] %vm2467_vm5, %v3846_v18 }
 0x32e PF: > { %s17_s24 = sadd.s32 1, %s4623_s24  }
 0x32f   : > { %p14_p4 = scmp.ge.s32.totalorder %s17_s24, 4  }
 0x331   :  { %16 = sbr.rel (!%p14_p4) target bundleno = 1 (0x1), region = 87 }

</bundles_post_ra>
